<compile_context>
chip_gen: v7x
topology: tpu7x:2x2x1
jax: 0.10.0
libtpu: 0.0.40
codegen_flags: <defaults>
</compile_context>

<pallas_src>
import math

import jax
import jax.numpy as jnp
from jax.experimental import pallas as pl
from jax.experimental.pallas import tpu as pltpu


# ---------------------------------------------------------------------------
# Model hyper-parameters (small, consistent with the module's __init__ args).
# ---------------------------------------------------------------------------
SEQ = 8            # seq_len
BATCH = 2          # batch_size
TOKENS = SEQ * BATCH
D_MODEL = 32       # d_model
NHEAD = 4          # nhead
HEAD_DIM = D_MODEL // NHEAD
D_HID = 64         # d_hid (FFN hidden)
NLAYERS = 2        # nlayers
LN_EPS = 1e-5
NEG_INF = -1e30


def _layer_norm_fast(x, w, b):
    """LayerNorm with two independent lane reductions (shorter dep chain)."""
    inv_d = 1.0 / D_MODEL
    s1 = jnp.sum(x, axis=-1, keepdims=True)
    s2 = jnp.sum(x * x, axis=-1, keepdims=True)
    mu = s1 * inv_d
    var = s2 * inv_d - mu * mu
    return (x - mu) * jax.lax.rsqrt(var + LN_EPS) * w + b


def encoder_kernel(
    src_ref,   # [T, D]        f32   flattened tokens, row = s*B + b
    pe_ref,    # [T, D]        f32   positional encoding, repeated per batch
    w_ref,     # [L, 128, 128] bf16  packed weights (see prepare_kernel_params)
    b_ref,     # [L, 8, 128]   f32   packed biases / LN params
    o_ref,     # [T, D]        f32
):
    D, DH, T, H, Hd = D_MODEL, D_HID, TOKENS, NHEAD, HEAD_DIM

    # --- PositionalEncoding: x = x + pe[:seq_len]  (dropout = identity) ---
    x = src_ref[...] + pe_ref[...]

    # Additive cross-batch mask for the sublane-stacked scores [H*T, T].
    # Token t belongs to batch (t % B); since T % B == 0, the stacked row
    # index (h*T + t) has the same residue mod B as t.
    row_b = jax.lax.broadcasted_iota(jnp.int32, (H * T, T), 0) % BATCH
    col_b = jax.lax.broadcasted_iota(jnp.int32, (H * T, T), 1) % BATCH
    mask_add = jnp.where(row_b == col_b, 0.0, NEG_INF).astype(jnp.float32)

    # --- TransformerEncoder: NLAYERS post-norm encoder layers ---
    for l in range(NLAYERS):
        w = w_ref[l]                       # [128, 128] bf16
        b = b_ref[l]                       # [8, 128]   f32
        b_qkv = b[0:1, 0:3 * D]            # q part pre-scaled
        attn_b = b[1:2, 0:D]
        ffn_b1 = b[2:3, 0:DH]
        ffn_b2 = b[3:4, 0:D]
        ln1_w, ln1_b = b[4:5, 0:D], b[5:6, 0:D]
        ln2_w, ln2_b = b[6:7, 0:D], b[7:8, 0:D]

        # ---- fused QKV projection: one MXU push (bf16 operands, f32 acc) ----
        xb = x.astype(jnp.bfloat16)
        qkv = jnp.dot(xb, w[0:D, 0:3 * D],
                      preferred_element_type=jnp.float32) + b_qkv     # [T, 3D]
        qkv_bf = qkv.astype(jnp.bfloat16)

        # ---- per-head scores stacked on sublanes -> ONE masked softmax ----
        s_parts = []
        for h in range(H):
            lo = h * Hd
            qh = qkv_bf[:, lo:lo + Hd]                # scaled q, head h
            kh = qkv_bf[:, D + lo:D + lo + Hd]
            s_parts.append(jax.lax.dot_general(
                qh, kh, (((1,), (1,)), ((), ())),
                preferred_element_type=jnp.float32))                   # [T, T]
        s = jnp.concatenate(s_parts, axis=0) + mask_add                # [H*T, T]
        s = s - jnp.max(s, axis=-1, keepdims=True)
        p = jnp.exp(s)
        p = p * pl.reciprocal(jnp.sum(p, axis=-1, keepdims=True), approx=True)
        pb = p.astype(jnp.bfloat16)

        # ---- p @ v per head, heads assembled into one [T, D] slab ----
        ctx_parts = []
        for h in range(H):
            vh = qkv_bf[:, 2 * D + h * Hd:2 * D + (h + 1) * Hd]
            ph = pb[h * T:(h + 1) * T, :]
            ctx_parts.append(jnp.dot(ph, vh,
                                     preferred_element_type=jnp.float32))
        ctx = jnp.concatenate(ctx_parts, axis=1).astype(jnp.bfloat16)  # [T, D]

        # ---- single attention out-projection ----
        attn = jnp.dot(ctx, w[0:D, 3 * D:4 * D],
                       preferred_element_type=jnp.float32) + attn_b

        # residual + layer norm 1  (dropout = identity, eval mode)
        x = _layer_norm_fast(x + attn, ln1_w, ln1_b)

        # ---- feed-forward (ReLU) ----
        h1 = jnp.dot(x.astype(jnp.bfloat16), w[D:2 * D, 0:DH],
                     preferred_element_type=jnp.float32) + ffn_b1
        h1 = jnp.maximum(h1, 0.0)
        h2 = jnp.dot(h1.astype(jnp.bfloat16), w[2 * D:2 * D + DH, 0:D],
                     preferred_element_type=jnp.float32) + ffn_b2

        # residual + layer norm 2
        x = _layer_norm_fast(x + h2, ln2_w, ln2_b)

    o_ref[...] = x.astype(o_ref.dtype)


def make_positional_encoding(max_len: int, d_model: int) -> jnp.ndarray:
    """Replicates PositionalEncoding.pe -> returns [max_len, d_model]."""
    position = jnp.arange(max_len, dtype=jnp.float32)[:, None]
    div_term = jnp.exp(jnp.arange(0, d_model, 2, dtype=jnp.float32)
                       * (-math.log(10000.0) / d_model))
    pe = jnp.zeros((max_len, d_model), dtype=jnp.float32)
    pe = pe.at[:, 0::2].set(jnp.sin(position * div_term))
    pe = pe.at[:, 1::2].set(jnp.cos(position * div_term))
    return pe


def init_params(key):
    """Deterministic synthetic parameters with PyTorch-layer shapes (f32)."""
    keys = jax.random.split(key, 8)
    u = lambda k, shape, fan_in: jax.random.uniform(
        k, shape, jnp.float32, -1.0 / math.sqrt(fan_in), 1.0 / math.sqrt(fan_in))
    L, D, H = NLAYERS, D_MODEL, D_HID
    return dict(
        in_proj_w=u(keys[0], (L, 3 * D, D), D),    # torch in_proj_weight [3D, D]
        in_proj_b=u(keys[1], (L, 3 * D), D),
        out_proj_w=u(keys[2], (L, D, D), D),       # torch out_proj.weight [D, D]
        out_proj_b=u(keys[3], (L, D), D),
        lin1_w=u(keys[4], (L, H, D), D),           # torch linear1.weight [H, D]
        lin1_b=u(keys[5], (L, H), D),
        lin2_w=u(keys[6], (L, D, H), H),           # torch linear2.weight [D, H]
        lin2_b=u(keys[7], (L, D), H),
        ln1_w=jnp.ones((L, D), jnp.float32),
        ln1_b=jnp.zeros((L, D), jnp.float32),
        ln2_w=jnp.ones((L, D), jnp.float32),
        ln2_b=jnp.zeros((L, D), jnp.float32),
    )


def prepare_kernel_params(p):
    """One-time conversion torch-layout f32 -> two lane-dense kernel slabs.

    Weight slab  [L, 128, 128] bf16:
      rows 0:32,  cols 0:96  : W_qkv^T (q columns pre-scaled by 1/sqrt(Hd))
      rows 0:32,  cols 96:128: W_o^T
      rows 32:64, cols 0:64  : W1^T
      rows 64:128,cols 0:32  : W2^T
    Bias slab    [L, 8, 128] f32:
      row 0: b_qkv (q part pre-scaled)   row 1: attn_b
      row 2: ffn_b1                      row 3: ffn_b2
      row 4: ln1_w   row 5: ln1_b        row 6: ln2_w   row 7: ln2_b
    """
    L, D, DH, Hd = NLAYERS, D_MODEL, D_HID, HEAD_DIM
    scale = 1.0 / math.sqrt(Hd)

    w_qkv = p["in_proj_w"].transpose(0, 2, 1)                  # [L, D, 3D]
    w_qkv = w_qkv.at[:, :, 0:D].multiply(scale)                # fold q scale
    w_o = p["out_proj_w"].transpose(0, 2, 1)                   # [L, D, D]
    w_1 = p["lin1_w"].transpose(0, 2, 1)                       # [L, D, DH]
    w_2 = p["lin2_w"].transpose(0, 2, 1)                       # [L, DH, D]

    w_slab = jnp.zeros((L, 128, 128), jnp.float32)
    w_slab = w_slab.at[:, 0:D, 0:3 * D].set(w_qkv)
    w_slab = w_slab.at[:, 0:D, 3 * D:4 * D].set(w_o)
    w_slab = w_slab.at[:, D:2 * D, 0:DH].set(w_1)
    w_slab = w_slab.at[:, 2 * D:2 * D + DH, 0:D].set(w_2)
    w_slab = w_slab.astype(jnp.bfloat16)

    b_qkv = p["in_proj_b"].at[:, 0:D].multiply(scale)          # [L, 3D]
    b_slab = jnp.zeros((L, 8, 128), jnp.float32)
    b_slab = b_slab.at[:, 0, 0:3 * D].set(b_qkv)
    b_slab = b_slab.at[:, 1, 0:D].set(p["out_proj_b"])
    b_slab = b_slab.at[:, 2, 0:DH].set(p["lin1_b"])
    b_slab = b_slab.at[:, 3, 0:D].set(p["lin2_b"])
    b_slab = b_slab.at[:, 4, 0:D].set(p["ln1_w"])
    b_slab = b_slab.at[:, 5, 0:D].set(p["ln1_b"])
    b_slab = b_slab.at[:, 6, 0:D].set(p["ln2_w"])
    b_slab = b_slab.at[:, 7, 0:D].set(p["ln2_b"])
    return dict(w=w_slab, b=b_slab)


def _vmem_spec():
    return pl.BlockSpec(memory_space=pltpu.MemorySpace.VMEM)


@jax.jit
def time_series_encoder(src_sbd, pe_tok, kp):
    """src_sbd: [seq_len, batch, d_model] (PyTorch layout). Returns same layout."""
    S, B, D = src_sbd.shape
    T = S * B
    src_tok = src_sbd.reshape(T, D)          # free row-major reshape, no transpose

    out_tok = pl.pallas_call(
        encoder_kernel,
        out_shape=jax.ShapeDtypeStruct((T, D), jnp.float32),
        in_specs=[_vmem_spec(), _vmem_spec(), _vmem_spec(), _vmem_spec()],
        out_specs=_vmem_spec(),
    )(src_tok, pe_tok, kp["w"], kp["b"])

    return out_tok.reshape(S, B, D)          # free reshape back to torch layout


# ---------------------------------------------------------------------------
# Pure-JAX f32 reference (torch eval-mode semantics) for a sanity check.
# ---------------------------------------------------------------------------
def _ln_ref(x, w, b):
    mu = jnp.mean(x, axis=-1, keepdims=True)
    var = jnp.mean((x - mu) ** 2, axis=-1, keepdims=True)
    return (x - mu) * jax.lax.rsqrt(var + LN_EPS) * w + b


def reference_forward(src_sbd, pe_full, p):
    S, B, D = src_sbd.shape
    x = src_sbd + pe_full[:S][:, None, :]
    scale = 1.0 / math.sqrt(HEAD_DIM)
    for l in range(NLAYERS):
        qkv = jnp.einsum("sbd,ed->sbe", x, p["in_proj_w"][l]) + p["in_proj_b"][l]
        q, k, v = jnp.split(qkv, 3, axis=-1)

        def split_heads(t):
            return t.reshape(S, B, NHEAD, HEAD_DIM).transpose(1, 2, 0, 3)

        qh, kh, vh = split_heads(q), split_heads(k), split_heads(v)
        s = jnp.einsum("bhqd,bhkd->bhqk", qh, kh) * scale
        pr = jax.nn.softmax(s, axis=-1)
        ctx = jnp.einsum("bhqk,bhkd->bhqd", pr, vh)
        ctx = ctx.transpose(2, 0, 1, 3).reshape(S, B, D)
        attn = jnp.einsum("sbd,ed->sbe", ctx, p["out_proj_w"][l]) + p["out_proj_b"][l]
        x = _ln_ref(x + attn, p["ln1_w"][l], p["ln1_b"][l])
        h1 = jax.nn.relu(jnp.einsum("sbd,hd->sbh", x, p["lin1_w"][l]) + p["lin1_b"][l])
        h2 = jnp.einsum("sbh,dh->sbd", h1, p["lin2_w"][l]) + p["lin2_b"][l]
        x = _ln_ref(x + h2, p["ln2_w"][l], p["ln2_b"][l])
    return x


if __name__ == "__main__":
    key = jax.random.PRNGKey(0)
    k_param, k_src = jax.random.split(key)

    params = init_params(k_param)
    kparams = prepare_kernel_params(params)

    pe_full = make_positional_encoding(max_len=3000, d_model=D_MODEL)
    # token-ordered PE ([T, D], row = s*B + b) precomputed once at setup time
    pe_tok = jnp.repeat(pe_full[:SEQ], BATCH, axis=0)

    # Post-embedding representation (TimeSeriesRnnEmbedding output) in the
    # module's [seq_len, batch_size, d_model] convention.
    src = jax.random.normal(k_src, (SEQ, BATCH, D_MODEL), dtype=jnp.float32)

    out = time_series_encoder(src, pe_tok, kparams)
    out = jax.block_until_ready(out)

    assert out.shape == (SEQ, BATCH, D_MODEL)
    assert bool(jnp.all(jnp.isfinite(out)))

    ref = reference_forward(src, pe_full, params)
    max_err = float(jnp.max(jnp.abs(out - ref)))
    assert max_err < 5e-2, f"kernel vs reference max abs error {max_err}"

    print("KERNEL_OK")
</pallas_src>

<mosaic_0001>
module attributes {stable_mosaic.version = 11 : i64} {
  func.func @encoder_kernel(%arg0: memref<16x32xf32, #tpu.memory_space<vmem>>, %arg1: memref<16x32xf32, #tpu.memory_space<vmem>>, %arg2: memref<2x128x128xbf16, #tpu.memory_space<vmem>>, %arg3: memref<2x8x128xf32, #tpu.memory_space<vmem>>, %arg4: memref<16x32xf32, #tpu.memory_space<vmem>>) attributes {dimension_semantics = [], scalar_prefetch = 0 : i64, scratch_operands = 0 : i64, tpu.core_type = #tpu.core_type<tc>} {
    %c0 = arith.constant 0 : index
    %c0_0 = arith.constant 0 : index
    %0 = vector.load %arg0[%c0, %c0_0] : memref<16x32xf32, #tpu.memory_space<vmem>>, vector<16x32xf32>
    %c0_1 = arith.constant 0 : index
    %c0_2 = arith.constant 0 : index
    %1 = vector.load %arg1[%c0_1, %c0_2] : memref<16x32xf32, #tpu.memory_space<vmem>>, vector<16x32xf32>
    %2 = arith.addf %0, %1 : vector<16x32xf32>
    %3 = tpu.iota {dimensions = array<i32: 0>} : vector<64x16xi32>
    %c2_i32 = arith.constant 2 : i32
    %c0_i32 = arith.constant 0 : i32
    %4 = arith.cmpi eq, %c2_i32, %c0_i32 : i32
    %c1_i32 = arith.constant 1 : i32
    %5 = arith.select %4, %c1_i32, %c2_i32 : i32
    %6 = vector.broadcast %5 : i32 to vector<64x16xi32>
    %7 = arith.remsi %3, %6 : vector<64x16xi32>
    %c0_i32_3 = arith.constant 0 : i32
    %8 = vector.broadcast %c0_i32_3 : i32 to vector<64x16xi32>
    %9 = arith.cmpi ne, %7, %8 : vector<64x16xi32>
    %c0_i32_4 = arith.constant 0 : i32
    %10 = vector.broadcast %c0_i32_4 : i32 to vector<64x16xi32>
    %11 = arith.cmpi slt, %7, %10 : vector<64x16xi32>
    %c0_i32_5 = arith.constant 0 : i32
    %12 = arith.cmpi slt, %5, %c0_i32_5 : i32
    %13 = vector.broadcast %12 : i1 to vector<64x16xi1>
    %14 = vector.broadcast %13 : vector<64x16xi1> to vector<64x16xi1>
    %15 = arith.xori %11, %14 : vector<64x16xi1>
    %16 = arith.andi %15, %9 : vector<64x16xi1>
    %17 = vector.broadcast %5 : i32 to vector<64x16xi32>
    %18 = arith.addi %7, %17 : vector<64x16xi32>
    %19 = arith.select %16, %18, %7 : vector<64x16xi1>, vector<64x16xi32>
    %20 = tpu.iota {dimensions = array<i32: 1>} : vector<64x16xi32>
    %c2_i32_6 = arith.constant 2 : i32
    %c0_i32_7 = arith.constant 0 : i32
    %21 = arith.cmpi eq, %c2_i32_6, %c0_i32_7 : i32
    %c1_i32_8 = arith.constant 1 : i32
    %22 = arith.select %21, %c1_i32_8, %c2_i32_6 : i32
    %23 = vector.broadcast %22 : i32 to vector<64x16xi32>
    %24 = arith.remsi %20, %23 : vector<64x16xi32>
    %c0_i32_9 = arith.constant 0 : i32
    %25 = vector.broadcast %c0_i32_9 : i32 to vector<64x16xi32>
    %26 = arith.cmpi ne, %24, %25 : vector<64x16xi32>
    %c0_i32_10 = arith.constant 0 : i32
    %27 = vector.broadcast %c0_i32_10 : i32 to vector<64x16xi32>
    %28 = arith.cmpi slt, %24, %27 : vector<64x16xi32>
    %c0_i32_11 = arith.constant 0 : i32
    %29 = arith.cmpi slt, %22, %c0_i32_11 : i32
    %30 = vector.broadcast %29 : i1 to vector<64x16xi1>
    %31 = vector.broadcast %30 : vector<64x16xi1> to vector<64x16xi1>
    %32 = arith.xori %28, %31 : vector<64x16xi1>
    %33 = arith.andi %32, %26 : vector<64x16xi1>
    %34 = vector.broadcast %22 : i32 to vector<64x16xi32>
    %35 = arith.addi %24, %34 : vector<64x16xi32>
    %36 = arith.select %33, %35, %24 : vector<64x16xi1>, vector<64x16xi32>
    %37 = arith.cmpi eq, %19, %36 : vector<64x16xi32>
    %cst = arith.constant 0.000000e+00 : f32
    %cst_12 = arith.constant -1.000000e+30 : f32
    %38 = vector.broadcast %cst : f32 to vector<64x16xf32>
    %39 = vector.broadcast %cst_12 : f32 to vector<64x16xf32>
    %40 = arith.select %37, %38, %39 : vector<64x16xi1>, vector<64x16xf32>
    %c0_13 = arith.constant 0 : index
    %c0_14 = arith.constant 0 : index
    %c0_15 = arith.constant 0 : index
    %41 = vector.load %arg2[%c0_13, %c0_14, %c0_15] : memref<2x128x128xbf16, #tpu.memory_space<vmem>>, vector<1x128x128xbf16>
    %42 = vector.shape_cast %41 : vector<1x128x128xbf16> to vector<128x128xbf16>
    %c0_16 = arith.constant 0 : index
    %c0_17 = arith.constant 0 : index
    %c0_18 = arith.constant 0 : index
    %43 = vector.load %arg3[%c0_16, %c0_17, %c0_18] : memref<2x8x128xf32, #tpu.memory_space<vmem>>, vector<1x8x128xf32>
    %44 = vector.shape_cast %43 : vector<1x8x128xf32> to vector<8x128xf32>
    %45 = vector.extract_strided_slice %44 {offsets = [0, 0], sizes = [1, 96], strides = [1, 1]} : vector<8x128xf32> to vector<1x96xf32>
    %46 = vector.extract_strided_slice %44 {offsets = [1, 0], sizes = [1, 32], strides = [1, 1]} : vector<8x128xf32> to vector<1x32xf32>
    %47 = vector.extract_strided_slice %44 {offsets = [2, 0], sizes = [1, 64], strides = [1, 1]} : vector<8x128xf32> to vector<1x64xf32>
    %48 = vector.extract_strided_slice %44 {offsets = [3, 0], sizes = [1, 32], strides = [1, 1]} : vector<8x128xf32> to vector<1x32xf32>
    %49 = vector.extract_strided_slice %44 {offsets = [4, 0], sizes = [1, 32], strides = [1, 1]} : vector<8x128xf32> to vector<1x32xf32>
    %50 = vector.extract_strided_slice %44 {offsets = [5, 0], sizes = [1, 32], strides = [1, 1]} : vector<8x128xf32> to vector<1x32xf32>
    %51 = vector.extract_strided_slice %44 {offsets = [6, 0], sizes = [1, 32], strides = [1, 1]} : vector<8x128xf32> to vector<1x32xf32>
    %52 = vector.extract_strided_slice %44 {offsets = [7, 0], sizes = [1, 32], strides = [1, 1]} : vector<8x128xf32> to vector<1x32xf32>
    %53 = arith.truncf %2 : vector<16x32xf32> to vector<16x32xbf16>
    %54 = vector.extract_strided_slice %42 {offsets = [0, 0], sizes = [32, 96], strides = [1, 1]} : vector<128x128xbf16> to vector<32x96xbf16>
    %cst_19 = arith.constant dense<0.000000e+00> : vector<16x96xf32>
    %55 = tpu.matmul %53, %54, %cst_19 {dimension_numbers = #tpu.dot_dimension_numbers<[1], [0], [0], [1], [0, 0, 1, 1], [], []>} : vector<16x32xbf16>, vector<32x96xbf16>, vector<16x96xf32> -> vector<16x96xf32>
    %56 = vector.broadcast %45 : vector<1x96xf32> to vector<16x96xf32>
    %57 = arith.addf %55, %56 : vector<16x96xf32>
    %58 = arith.truncf %57 : vector<16x96xf32> to vector<16x96xbf16>
    %59 = vector.extract_strided_slice %58 {offsets = [0, 0], sizes = [16, 8], strides = [1, 1]} : vector<16x96xbf16> to vector<16x8xbf16>
    %60 = vector.extract_strided_slice %58 {offsets = [0, 32], sizes = [16, 8], strides = [1, 1]} : vector<16x96xbf16> to vector<16x8xbf16>
    %cst_20 = arith.constant dense<0.000000e+00> : vector<16x16xf32>
    %61 = tpu.matmul %59, %60, %cst_20 {dimension_numbers = #tpu.dot_dimension_numbers<[1], [1], [0], [0], [0, 0, 1, 0], [], []>} : vector<16x8xbf16>, vector<16x8xbf16>, vector<16x16xf32> -> vector<16x16xf32>
    %62 = vector.extract_strided_slice %58 {offsets = [0, 8], sizes = [16, 8], strides = [1, 1]} : vector<16x96xbf16> to vector<16x8xbf16>
    %63 = vector.extract_strided_slice %58 {offsets = [0, 40], sizes = [16, 8], strides = [1, 1]} : vector<16x96xbf16> to vector<16x8xbf16>
    %cst_21 = arith.constant dense<0.000000e+00> : vector<16x16xf32>
    %64 = tpu.matmul %62, %63, %cst_21 {dimension_numbers = #tpu.dot_dimension_numbers<[1], [1], [0], [0], [0, 0, 1, 0], [], []>} : vector<16x8xbf16>, vector<16x8xbf16>, vector<16x16xf32> -> vector<16x16xf32>
    %65 = vector.extract_strided_slice %58 {offsets = [0, 16], sizes = [16, 8], strides = [1, 1]} : vector<16x96xbf16> to vector<16x8xbf16>
    %66 = vector.extract_strided_slice %58 {offsets = [0, 48], sizes = [16, 8], strides = [1, 1]} : vector<16x96xbf16> to vector<16x8xbf16>
    %cst_22 = arith.constant dense<0.000000e+00> : vector<16x16xf32>
    %67 = tpu.matmul %65, %66, %cst_22 {dimension_numbers = #tpu.dot_dimension_numbers<[1], [1], [0], [0], [0, 0, 1, 0], [], []>} : vector<16x8xbf16>, vector<16x8xbf16>, vector<16x16xf32> -> vector<16x16xf32>
    %68 = vector.extract_strided_slice %58 {offsets = [0, 24], sizes = [16, 8], strides = [1, 1]} : vector<16x96xbf16> to vector<16x8xbf16>
    %69 = vector.extract_strided_slice %58 {offsets = [0, 56], sizes = [16, 8], strides = [1, 1]} : vector<16x96xbf16> to vector<16x8xbf16>
    %cst_23 = arith.constant dense<0.000000e+00> : vector<16x16xf32>
    %70 = tpu.matmul %68, %69, %cst_23 {dimension_numbers = #tpu.dot_dimension_numbers<[1], [1], [0], [0], [0, 0, 1, 0], [], []>} : vector<16x8xbf16>, vector<16x8xbf16>, vector<16x16xf32> -> vector<16x16xf32>
    %71 = tpu.concatenate %61, %64, %67, %70 in 0 : vector<16x16xf32>, vector<16x16xf32>, vector<16x16xf32>, vector<16x16xf32> -> vector<64x16xf32>
    %72 = arith.addf %71, %40 : vector<64x16xf32>
    %cst_24 = arith.constant dense<0xFF800000> : vector<64xf32>
    %73 = vector.multi_reduction <maximumf>, %72, %cst_24 [1] : vector<64x16xf32> to vector<64xf32>
    %74 = vector.shape_cast %73 : vector<64xf32> to vector<64x1xf32>
    %75 = vector.broadcast %74 : vector<64x1xf32> to vector<64x16xf32>
    %76 = arith.subf %72, %75 : vector<64x16xf32>
    %77 = math.exp %76 : vector<64x16xf32>
    %cst_25 = arith.constant dense<0.000000e+00> : vector<64xf32>
    %78 = vector.multi_reduction <add>, %77, %cst_25 [1] : vector<64x16xf32> to vector<64xf32>
    %79 = vector.shape_cast %78 : vector<64xf32> to vector<64x1xf32>
    %80 = tpu.reciprocal %79 {approx = true} : vector<64x1xf32> -> vector<64x1xf32>
    %81 = vector.broadcast %80 : vector<64x1xf32> to vector<64x16xf32>
    %82 = arith.mulf %77, %81 : vector<64x16xf32>
    %83 = arith.truncf %82 : vector<64x16xf32> to vector<64x16xbf16>
    %84 = vector.extract_strided_slice %58 {offsets = [0, 64], sizes = [16, 8], strides = [1, 1]} : vector<16x96xbf16> to vector<16x8xbf16>
    %85 = vector.extract_strided_slice %83 {offsets = [0, 0], sizes = [16, 16], strides = [1, 1]} : vector<64x16xbf16> to vector<16x16xbf16>
    %cst_26 = arith.constant dense<0.000000e+00> : vector<16x8xf32>
    %86 = tpu.matmul %85, %84, %cst_26 {dimension_numbers = #tpu.dot_dimension_numbers<[1], [0], [0], [1], [0, 0, 1, 1], [], []>} : vector<16x16xbf16>, vector<16x8xbf16>, vector<16x8xf32> -> vector<16x8xf32>
    %87 = vector.extract_strided_slice %58 {offsets = [0, 72], sizes = [16, 8], strides = [1, 1]} : vector<16x96xbf16> to vector<16x8xbf16>
    %88 = vector.extract_strided_slice %83 {offsets = [16, 0], sizes = [16, 16], strides = [1, 1]} : vector<64x16xbf16> to vector<16x16xbf16>
    %cst_27 = arith.constant dense<0.000000e+00> : vector<16x8xf32>
    %89 = tpu.matmul %88, %87, %cst_27 {dimension_numbers = #tpu.dot_dimension_numbers<[1], [0], [0], [1], [0, 0, 1, 1], [], []>} : vector<16x16xbf16>, vector<16x8xbf16>, vector<16x8xf32> -> vector<16x8xf32>
    %90 = vector.extract_strided_slice %58 {offsets = [0, 80], sizes = [16, 8], strides = [1, 1]} : vector<16x96xbf16> to vector<16x8xbf16>
    %91 = vector.extract_strided_slice %83 {offsets = [32, 0], sizes = [16, 16], strides = [1, 1]} : vector<64x16xbf16> to vector<16x16xbf16>
    %cst_28 = arith.constant dense<0.000000e+00> : vector<16x8xf32>
    %92 = tpu.matmul %91, %90, %cst_28 {dimension_numbers = #tpu.dot_dimension_numbers<[1], [0], [0], [1], [0, 0, 1, 1], [], []>} : vector<16x16xbf16>, vector<16x8xbf16>, vector<16x8xf32> -> vector<16x8xf32>
    %93 = vector.extract_strided_slice %58 {offsets = [0, 88], sizes = [16, 8], strides = [1, 1]} : vector<16x96xbf16> to vector<16x8xbf16>
    %94 = vector.extract_strided_slice %83 {offsets = [48, 0], sizes = [16, 16], strides = [1, 1]} : vector<64x16xbf16> to vector<16x16xbf16>
    %cst_29 = arith.constant dense<0.000000e+00> : vector<16x8xf32>
    %95 = tpu.matmul %94, %93, %cst_29 {dimension_numbers = #tpu.dot_dimension_numbers<[1], [0], [0], [1], [0, 0, 1, 1], [], []>} : vector<16x16xbf16>, vector<16x8xbf16>, vector<16x8xf32> -> vector<16x8xf32>
    %96 = tpu.concatenate %86, %89, %92, %95 in 1 : vector<16x8xf32>, vector<16x8xf32>, vector<16x8xf32>, vector<16x8xf32> -> vector<16x32xf32>
    %97 = arith.truncf %96 : vector<16x32xf32> to vector<16x32xbf16>
    %98 = vector.extract_strided_slice %42 {offsets = [0, 96], sizes = [32, 32], strides = [1, 1]} : vector<128x128xbf16> to vector<32x32xbf16>
    %cst_30 = arith.constant dense<0.000000e+00> : vector<16x32xf32>
    %99 = tpu.matmul %97, %98, %cst_30 {dimension_numbers = #tpu.dot_dimension_numbers<[1], [0], [0], [1], [0, 0, 1, 1], [], []>} : vector<16x32xbf16>, vector<32x32xbf16>, vector<16x32xf32> -> vector<16x32xf32>
    %100 = vector.broadcast %46 : vector<1x32xf32> to vector<16x32xf32>
    %101 = arith.addf %99, %100 : vector<16x32xf32>
    %102 = arith.addf %2, %101 : vector<16x32xf32>
    %cst_31 = arith.constant dense<0.000000e+00> : vector<16xf32>
    %103 = vector.multi_reduction <add>, %102, %cst_31 [1] : vector<16x32xf32> to vector<16xf32>
    %104 = vector.shape_cast %103 : vector<16xf32> to vector<16x1xf32>
    %105 = arith.mulf %102, %102 : vector<16x32xf32>
    %cst_32 = arith.constant dense<0.000000e+00> : vector<16xf32>
    %106 = vector.multi_reduction <add>, %105, %cst_32 [1] : vector<16x32xf32> to vector<16xf32>
    %107 = vector.shape_cast %106 : vector<16xf32> to vector<16x1xf32>
    %cst_33 = arith.constant 3.125000e-02 : f32
    %108 = vector.broadcast %cst_33 : f32 to vector<16x1xf32>
    %109 = arith.mulf %104, %108 : vector<16x1xf32>
    %cst_34 = arith.constant 3.125000e-02 : f32
    %110 = vector.broadcast %cst_34 : f32 to vector<16x1xf32>
    %111 = arith.mulf %107, %110 : vector<16x1xf32>
    %112 = arith.mulf %109, %109 : vector<16x1xf32>
    %113 = arith.subf %111, %112 : vector<16x1xf32>
    %114 = vector.broadcast %109 : vector<16x1xf32> to vector<16x32xf32>
    %115 = arith.subf %102, %114 : vector<16x32xf32>
    %cst_35 = arith.constant 9.99999974E-6 : f32
    %116 = vector.broadcast %cst_35 : f32 to vector<16x1xf32>
    %117 = arith.addf %113, %116 : vector<16x1xf32>
    %118 = math.rsqrt %117 : vector<16x1xf32>
    %119 = vector.broadcast %118 : vector<16x1xf32> to vector<16x32xf32>
    %120 = arith.mulf %115, %119 : vector<16x32xf32>
    %121 = vector.broadcast %49 : vector<1x32xf32> to vector<16x32xf32>
    %122 = arith.mulf %120, %121 : vector<16x32xf32>
    %123 = vector.broadcast %50 : vector<1x32xf32> to vector<16x32xf32>
    %124 = arith.addf %122, %123 : vector<16x32xf32>
    %125 = arith.truncf %124 : vector<16x32xf32> to vector<16x32xbf16>
    %126 = vector.extract_strided_slice %42 {offsets = [32, 0], sizes = [32, 64], strides = [1, 1]} : vector<128x128xbf16> to vector<32x64xbf16>
    %cst_36 = arith.constant dense<0.000000e+00> : vector<16x64xf32>
    %127 = tpu.matmul %125, %126, %cst_36 {dimension_numbers = #tpu.dot_dimension_numbers<[1], [0], [0], [1], [0, 0, 1, 1], [], []>} : vector<16x32xbf16>, vector<32x64xbf16>, vector<16x64xf32> -> vector<16x64xf32>
    %128 = vector.broadcast %47 : vector<1x64xf32> to vector<16x64xf32>
    %129 = arith.addf %127, %128 : vector<16x64xf32>
    %cst_37 = arith.constant 0.000000e+00 : f32
    %130 = vector.broadcast %cst_37 : f32 to vector<16x64xf32>
    %131 = arith.maximumf %129, %130 : vector<16x64xf32>
    %132 = arith.truncf %131 : vector<16x64xf32> to vector<16x64xbf16>
    %133 = vector.extract_strided_slice %42 {offsets = [64, 0], sizes = [64, 32], strides = [1, 1]} : vector<128x128xbf16> to vector<64x32xbf16>
    %cst_38 = arith.constant dense<0.000000e+00> : vector<16x32xf32>
    %134 = tpu.matmul %132, %133, %cst_38 {dimension_numbers = #tpu.dot_dimension_numbers<[1], [0], [0], [1], [0, 0, 1, 1], [], []>} : vector<16x64xbf16>, vector<64x32xbf16>, vector<16x32xf32> -> vector<16x32xf32>
    %135 = vector.broadcast %48 : vector<1x32xf32> to vector<16x32xf32>
    %136 = arith.addf %134, %135 : vector<16x32xf32>
    %137 = arith.addf %124, %136 : vector<16x32xf32>
    %cst_39 = arith.constant dense<0.000000e+00> : vector<16xf32>
    %138 = vector.multi_reduction <add>, %137, %cst_39 [1] : vector<16x32xf32> to vector<16xf32>
    %139 = vector.shape_cast %138 : vector<16xf32> to vector<16x1xf32>
    %140 = arith.mulf %137, %137 : vector<16x32xf32>
    %cst_40 = arith.constant dense<0.000000e+00> : vector<16xf32>
    %141 = vector.multi_reduction <add>, %140, %cst_40 [1] : vector<16x32xf32> to vector<16xf32>
    %142 = vector.shape_cast %141 : vector<16xf32> to vector<16x1xf32>
    %cst_41 = arith.constant 3.125000e-02 : f32
    %143 = vector.broadcast %cst_41 : f32 to vector<16x1xf32>
    %144 = arith.mulf %139, %143 : vector<16x1xf32>
    %cst_42 = arith.constant 3.125000e-02 : f32
    %145 = vector.broadcast %cst_42 : f32 to vector<16x1xf32>
    %146 = arith.mulf %142, %145 : vector<16x1xf32>
    %147 = arith.mulf %144, %144 : vector<16x1xf32>
    %148 = arith.subf %146, %147 : vector<16x1xf32>
    %149 = vector.broadcast %144 : vector<16x1xf32> to vector<16x32xf32>
    %150 = arith.subf %137, %149 : vector<16x32xf32>
    %cst_43 = arith.constant 9.99999974E-6 : f32
    %151 = vector.broadcast %cst_43 : f32 to vector<16x1xf32>
    %152 = arith.addf %148, %151 : vector<16x1xf32>
    %153 = math.rsqrt %152 : vector<16x1xf32>
    %154 = vector.broadcast %153 : vector<16x1xf32> to vector<16x32xf32>
    %155 = arith.mulf %150, %154 : vector<16x32xf32>
    %156 = vector.broadcast %51 : vector<1x32xf32> to vector<16x32xf32>
    %157 = arith.mulf %155, %156 : vector<16x32xf32>
    %158 = vector.broadcast %52 : vector<1x32xf32> to vector<16x32xf32>
    %159 = arith.addf %157, %158 : vector<16x32xf32>
    %c1 = arith.constant 1 : index
    %c0_44 = arith.constant 0 : index
    %c0_45 = arith.constant 0 : index
    %160 = vector.load %arg2[%c1, %c0_44, %c0_45] : memref<2x128x128xbf16, #tpu.memory_space<vmem>>, vector<1x128x128xbf16>
    %161 = vector.shape_cast %160 : vector<1x128x128xbf16> to vector<128x128xbf16>
    %c1_46 = arith.constant 1 : index
    %c0_47 = arith.constant 0 : index
    %c0_48 = arith.constant 0 : index
    %162 = vector.load %arg3[%c1_46, %c0_47, %c0_48] : memref<2x8x128xf32, #tpu.memory_space<vmem>>, vector<1x8x128xf32>
    %163 = vector.shape_cast %162 : vector<1x8x128xf32> to vector<8x128xf32>
    %164 = vector.extract_strided_slice %163 {offsets = [0, 0], sizes = [1, 96], strides = [1, 1]} : vector<8x128xf32> to vector<1x96xf32>
    %165 = vector.extract_strided_slice %163 {offsets = [1, 0], sizes = [1, 32], strides = [1, 1]} : vector<8x128xf32> to vector<1x32xf32>
    %166 = vector.extract_strided_slice %163 {offsets = [2, 0], sizes = [1, 64], strides = [1, 1]} : vector<8x128xf32> to vector<1x64xf32>
    %167 = vector.extract_strided_slice %163 {offsets = [3, 0], sizes = [1, 32], strides = [1, 1]} : vector<8x128xf32> to vector<1x32xf32>
    %168 = vector.extract_strided_slice %163 {offsets = [4, 0], sizes = [1, 32], strides = [1, 1]} : vector<8x128xf32> to vector<1x32xf32>
    %169 = vector.extract_strided_slice %163 {offsets = [5, 0], sizes = [1, 32], strides = [1, 1]} : vector<8x128xf32> to vector<1x32xf32>
    %170 = vector.extract_strided_slice %163 {offsets = [6, 0], sizes = [1, 32], strides = [1, 1]} : vector<8x128xf32> to vector<1x32xf32>
    %171 = vector.extract_strided_slice %163 {offsets = [7, 0], sizes = [1, 32], strides = [1, 1]} : vector<8x128xf32> to vector<1x32xf32>
    %172 = arith.truncf %159 : vector<16x32xf32> to vector<16x32xbf16>
    %173 = vector.extract_strided_slice %161 {offsets = [0, 0], sizes = [32, 96], strides = [1, 1]} : vector<128x128xbf16> to vector<32x96xbf16>
    %cst_49 = arith.constant dense<0.000000e+00> : vector<16x96xf32>
    %174 = tpu.matmul %172, %173, %cst_49 {dimension_numbers = #tpu.dot_dimension_numbers<[1], [0], [0], [1], [0, 0, 1, 1], [], []>} : vector<16x32xbf16>, vector<32x96xbf16>, vector<16x96xf32> -> vector<16x96xf32>
    %175 = vector.broadcast %164 : vector<1x96xf32> to vector<16x96xf32>
    %176 = arith.addf %174, %175 : vector<16x96xf32>
    %177 = arith.truncf %176 : vector<16x96xf32> to vector<16x96xbf16>
    %178 = vector.extract_strided_slice %177 {offsets = [0, 0], sizes = [16, 8], strides = [1, 1]} : vector<16x96xbf16> to vector<16x8xbf16>
    %179 = vector.extract_strided_slice %177 {offsets = [0, 32], sizes = [16, 8], strides = [1, 1]} : vector<16x96xbf16> to vector<16x8xbf16>
    %cst_50 = arith.constant dense<0.000000e+00> : vector<16x16xf32>
    %180 = tpu.matmul %178, %179, %cst_50 {dimension_numbers = #tpu.dot_dimension_numbers<[1], [1], [0], [0], [0, 0, 1, 0], [], []>} : vector<16x8xbf16>, vector<16x8xbf16>, vector<16x16xf32> -> vector<16x16xf32>
    %181 = vector.extract_strided_slice %177 {offsets = [0, 8], sizes = [16, 8], strides = [1, 1]} : vector<16x96xbf16> to vector<16x8xbf16>
    %182 = vector.extract_strided_slice %177 {offsets = [0, 40], sizes = [16, 8], strides = [1, 1]} : vector<16x96xbf16> to vector<16x8xbf16>
    %cst_51 = arith.constant dense<0.000000e+00> : vector<16x16xf32>
    %183 = tpu.matmul %181, %182, %cst_51 {dimension_numbers = #tpu.dot_dimension_numbers<[1], [1], [0], [0], [0, 0, 1, 0], [], []>} : vector<16x8xbf16>, vector<16x8xbf16>, vector<16x16xf32> -> vector<16x16xf32>
    %184 = vector.extract_strided_slice %177 {offsets = [0, 16], sizes = [16, 8], strides = [1, 1]} : vector<16x96xbf16> to vector<16x8xbf16>
    %185 = vector.extract_strided_slice %177 {offsets = [0, 48], sizes = [16, 8], strides = [1, 1]} : vector<16x96xbf16> to vector<16x8xbf16>
    %cst_52 = arith.constant dense<0.000000e+00> : vector<16x16xf32>
    %186 = tpu.matmul %184, %185, %cst_52 {dimension_numbers = #tpu.dot_dimension_numbers<[1], [1], [0], [0], [0, 0, 1, 0], [], []>} : vector<16x8xbf16>, vector<16x8xbf16>, vector<16x16xf32> -> vector<16x16xf32>
    %187 = vector.extract_strided_slice %177 {offsets = [0, 24], sizes = [16, 8], strides = [1, 1]} : vector<16x96xbf16> to vector<16x8xbf16>
    %188 = vector.extract_strided_slice %177 {offsets = [0, 56], sizes = [16, 8], strides = [1, 1]} : vector<16x96xbf16> to vector<16x8xbf16>
    %cst_53 = arith.constant dense<0.000000e+00> : vector<16x16xf32>
    %189 = tpu.matmul %187, %188, %cst_53 {dimension_numbers = #tpu.dot_dimension_numbers<[1], [1], [0], [0], [0, 0, 1, 0], [], []>} : vector<16x8xbf16>, vector<16x8xbf16>, vector<16x16xf32> -> vector<16x16xf32>
    %190 = tpu.concatenate %180, %183, %186, %189 in 0 : vector<16x16xf32>, vector<16x16xf32>, vector<16x16xf32>, vector<16x16xf32> -> vector<64x16xf32>
    %191 = arith.addf %190, %40 : vector<64x16xf32>
    %cst_54 = arith.constant dense<0xFF800000> : vector<64xf32>
    %192 = vector.multi_reduction <maximumf>, %191, %cst_54 [1] : vector<64x16xf32> to vector<64xf32>
    %193 = vector.shape_cast %192 : vector<64xf32> to vector<64x1xf32>
    %194 = vector.broadcast %193 : vector<64x1xf32> to vector<64x16xf32>
    %195 = arith.subf %191, %194 : vector<64x16xf32>
    %196 = math.exp %195 : vector<64x16xf32>
    %cst_55 = arith.constant dense<0.000000e+00> : vector<64xf32>
    %197 = vector.multi_reduction <add>, %196, %cst_55 [1] : vector<64x16xf32> to vector<64xf32>
    %198 = vector.shape_cast %197 : vector<64xf32> to vector<64x1xf32>
    %199 = tpu.reciprocal %198 {approx = true} : vector<64x1xf32> -> vector<64x1xf32>
    %200 = vector.broadcast %199 : vector<64x1xf32> to vector<64x16xf32>
    %201 = arith.mulf %196, %200 : vector<64x16xf32>
    %202 = arith.truncf %201 : vector<64x16xf32> to vector<64x16xbf16>
    %203 = vector.extract_strided_slice %177 {offsets = [0, 64], sizes = [16, 8], strides = [1, 1]} : vector<16x96xbf16> to vector<16x8xbf16>
    %204 = vector.extract_strided_slice %202 {offsets = [0, 0], sizes = [16, 16], strides = [1, 1]} : vector<64x16xbf16> to vector<16x16xbf16>
    %cst_56 = arith.constant dense<0.000000e+00> : vector<16x8xf32>
    %205 = tpu.matmul %204, %203, %cst_56 {dimension_numbers = #tpu.dot_dimension_numbers<[1], [0], [0], [1], [0, 0, 1, 1], [], []>} : vector<16x16xbf16>, vector<16x8xbf16>, vector<16x8xf32> -> vector<16x8xf32>
    %206 = vector.extract_strided_slice %177 {offsets = [0, 72], sizes = [16, 8], strides = [1, 1]} : vector<16x96xbf16> to vector<16x8xbf16>
    %207 = vector.extract_strided_slice %202 {offsets = [16, 0], sizes = [16, 16], strides = [1, 1]} : vector<64x16xbf16> to vector<16x16xbf16>
    %cst_57 = arith.constant dense<0.000000e+00> : vector<16x8xf32>
    %208 = tpu.matmul %207, %206, %cst_57 {dimension_numbers = #tpu.dot_dimension_numbers<[1], [0], [0], [1], [0, 0, 1, 1], [], []>} : vector<16x16xbf16>, vector<16x8xbf16>, vector<16x8xf32> -> vector<16x8xf32>
    %209 = vector.extract_strided_slice %177 {offsets = [0, 80], sizes = [16, 8], strides = [1, 1]} : vector<16x96xbf16> to vector<16x8xbf16>
    %210 = vector.extract_strided_slice %202 {offsets = [32, 0], sizes = [16, 16], strides = [1, 1]} : vector<64x16xbf16> to vector<16x16xbf16>
    %cst_58 = arith.constant dense<0.000000e+00> : vector<16x8xf32>
    %211 = tpu.matmul %210, %209, %cst_58 {dimension_numbers = #tpu.dot_dimension_numbers<[1], [0], [0], [1], [0, 0, 1, 1], [], []>} : vector<16x16xbf16>, vector<16x8xbf16>, vector<16x8xf32> -> vector<16x8xf32>
    %212 = vector.extract_strided_slice %177 {offsets = [0, 88], sizes = [16, 8], strides = [1, 1]} : vector<16x96xbf16> to vector<16x8xbf16>
    %213 = vector.extract_strided_slice %202 {offsets = [48, 0], sizes = [16, 16], strides = [1, 1]} : vector<64x16xbf16> to vector<16x16xbf16>
    %cst_59 = arith.constant dense<0.000000e+00> : vector<16x8xf32>
    %214 = tpu.matmul %213, %212, %cst_59 {dimension_numbers = #tpu.dot_dimension_numbers<[1], [0], [0], [1], [0, 0, 1, 1], [], []>} : vector<16x16xbf16>, vector<16x8xbf16>, vector<16x8xf32> -> vector<16x8xf32>
    %215 = tpu.concatenate %205, %208, %211, %214 in 1 : vector<16x8xf32>, vector<16x8xf32>, vector<16x8xf32>, vector<16x8xf32> -> vector<16x32xf32>
    %216 = arith.truncf %215 : vector<16x32xf32> to vector<16x32xbf16>
    %217 = vector.extract_strided_slice %161 {offsets = [0, 96], sizes = [32, 32], strides = [1, 1]} : vector<128x128xbf16> to vector<32x32xbf16>
    %cst_60 = arith.constant dense<0.000000e+00> : vector<16x32xf32>
    %218 = tpu.matmul %216, %217, %cst_60 {dimension_numbers = #tpu.dot_dimension_numbers<[1], [0], [0], [1], [0, 0, 1, 1], [], []>} : vector<16x32xbf16>, vector<32x32xbf16>, vector<16x32xf32> -> vector<16x32xf32>
    %219 = vector.broadcast %165 : vector<1x32xf32> to vector<16x32xf32>
    %220 = arith.addf %218, %219 : vector<16x32xf32>
    %221 = arith.addf %159, %220 : vector<16x32xf32>
    %cst_61 = arith.constant dense<0.000000e+00> : vector<16xf32>
    %222 = vector.multi_reduction <add>, %221, %cst_61 [1] : vector<16x32xf32> to vector<16xf32>
    %223 = vector.shape_cast %222 : vector<16xf32> to vector<16x1xf32>
    %224 = arith.mulf %221, %221 : vector<16x32xf32>
    %cst_62 = arith.constant dense<0.000000e+00> : vector<16xf32>
    %225 = vector.multi_reduction <add>, %224, %cst_62 [1] : vector<16x32xf32> to vector<16xf32>
    %226 = vector.shape_cast %225 : vector<16xf32> to vector<16x1xf32>
    %cst_63 = arith.constant 3.125000e-02 : f32
    %227 = vector.broadcast %cst_63 : f32 to vector<16x1xf32>
    %228 = arith.mulf %223, %227 : vector<16x1xf32>
    %cst_64 = arith.constant 3.125000e-02 : f32
    %229 = vector.broadcast %cst_64 : f32 to vector<16x1xf32>
    %230 = arith.mulf %226, %229 : vector<16x1xf32>
    %231 = arith.mulf %228, %228 : vector<16x1xf32>
    %232 = arith.subf %230, %231 : vector<16x1xf32>
    %233 = vector.broadcast %228 : vector<16x1xf32> to vector<16x32xf32>
    %234 = arith.subf %221, %233 : vector<16x32xf32>
    %cst_65 = arith.constant 9.99999974E-6 : f32
    %235 = vector.broadcast %cst_65 : f32 to vector<16x1xf32>
    %236 = arith.addf %232, %235 : vector<16x1xf32>
    %237 = math.rsqrt %236 : vector<16x1xf32>
    %238 = vector.broadcast %237 : vector<16x1xf32> to vector<16x32xf32>
    %239 = arith.mulf %234, %238 : vector<16x32xf32>
    %240 = vector.broadcast %168 : vector<1x32xf32> to vector<16x32xf32>
    %241 = arith.mulf %239, %240 : vector<16x32xf32>
    %242 = vector.broadcast %169 : vector<1x32xf32> to vector<16x32xf32>
    %243 = arith.addf %241, %242 : vector<16x32xf32>
    %244 = arith.truncf %243 : vector<16x32xf32> to vector<16x32xbf16>
    %245 = vector.extract_strided_slice %161 {offsets = [32, 0], sizes = [32, 64], strides = [1, 1]} : vector<128x128xbf16> to vector<32x64xbf16>
    %cst_66 = arith.constant dense<0.000000e+00> : vector<16x64xf32>
    %246 = tpu.matmul %244, %245, %cst_66 {dimension_numbers = #tpu.dot_dimension_numbers<[1], [0], [0], [1], [0, 0, 1, 1], [], []>} : vector<16x32xbf16>, vector<32x64xbf16>, vector<16x64xf32> -> vector<16x64xf32>
    %247 = vector.broadcast %166 : vector<1x64xf32> to vector<16x64xf32>
    %248 = arith.addf %246, %247 : vector<16x64xf32>
    %cst_67 = arith.constant 0.000000e+00 : f32
    %249 = vector.broadcast %cst_67 : f32 to vector<16x64xf32>
    %250 = arith.maximumf %248, %249 : vector<16x64xf32>
    %251 = arith.truncf %250 : vector<16x64xf32> to vector<16x64xbf16>
    %252 = vector.extract_strided_slice %161 {offsets = [64, 0], sizes = [64, 32], strides = [1, 1]} : vector<128x128xbf16> to vector<64x32xbf16>
    %cst_68 = arith.constant dense<0.000000e+00> : vector<16x32xf32>
    %253 = tpu.matmul %251, %252, %cst_68 {dimension_numbers = #tpu.dot_dimension_numbers<[1], [0], [0], [1], [0, 0, 1, 1], [], []>} : vector<16x64xbf16>, vector<64x32xbf16>, vector<16x32xf32> -> vector<16x32xf32>
    %254 = vector.broadcast %167 : vector<1x32xf32> to vector<16x32xf32>
    %255 = arith.addf %253, %254 : vector<16x32xf32>
    %256 = arith.addf %243, %255 : vector<16x32xf32>
    %cst_69 = arith.constant dense<0.000000e+00> : vector<16xf32>
    %257 = vector.multi_reduction <add>, %256, %cst_69 [1] : vector<16x32xf32> to vector<16xf32>
    %258 = vector.shape_cast %257 : vector<16xf32> to vector<16x1xf32>
    %259 = arith.mulf %256, %256 : vector<16x32xf32>
    %cst_70 = arith.constant dense<0.000000e+00> : vector<16xf32>
    %260 = vector.multi_reduction <add>, %259, %cst_70 [1] : vector<16x32xf32> to vector<16xf32>
    %261 = vector.shape_cast %260 : vector<16xf32> to vector<16x1xf32>
    %cst_71 = arith.constant 3.125000e-02 : f32
    %262 = vector.broadcast %cst_71 : f32 to vector<16x1xf32>
    %263 = arith.mulf %258, %262 : vector<16x1xf32>
    %cst_72 = arith.constant 3.125000e-02 : f32
    %264 = vector.broadcast %cst_72 : f32 to vector<16x1xf32>
    %265 = arith.mulf %261, %264 : vector<16x1xf32>
    %266 = arith.mulf %263, %263 : vector<16x1xf32>
    %267 = arith.subf %265, %266 : vector<16x1xf32>
    %268 = vector.broadcast %263 : vector<16x1xf32> to vector<16x32xf32>
    %269 = arith.subf %256, %268 : vector<16x32xf32>
    %cst_73 = arith.constant 9.99999974E-6 : f32
    %270 = vector.broadcast %cst_73 : f32 to vector<16x1xf32>
    %271 = arith.addf %267, %270 : vector<16x1xf32>
    %272 = math.rsqrt %271 : vector<16x1xf32>
    %273 = vector.broadcast %272 : vector<16x1xf32> to vector<16x32xf32>
    %274 = arith.mulf %269, %273 : vector<16x32xf32>
    %275 = vector.broadcast %170 : vector<1x32xf32> to vector<16x32xf32>
    %276 = arith.mulf %274, %275 : vector<16x32xf32>
    %277 = vector.broadcast %171 : vector<1x32xf32> to vector<16x32xf32>
    %278 = arith.addf %276, %277 : vector<16x32xf32>
    %c0_74 = arith.constant 0 : index
    %c0_75 = arith.constant 0 : index
    %279 = vector.load %arg4[%c0_74, %c0_75] : memref<16x32xf32, #tpu.memory_space<vmem>>, vector<16x32xf32>
    tpu.vector_store %arg4[%c0_74, %c0_75], %278 {strides = array<i32>} : memref<16x32xf32, #tpu.memory_space<vmem>>, vector<16x32xf32>,
    return
  }
}

</mosaic_0001>

<bundles_post_ra>
// kernel: time_series_encoder.1
= control target key start
LH: loop header
LB: loop body
LE: loop exit
PB: predicated region body
PF: predicated region fallthrough
CT: control target
= control target key end

     0   :  { %9 = vsyncpa [#allocation3], 0  ;;  %s3041_s0 = inlined_call_operand.hbm [shape: f32[16,32], index: 0, kind: input, shape index: {}]   ;;  %s3042_s1 = inlined_call_operand.hbm [shape: f32[16,32], index: 1, kind: input, shape index: {}]   ;;  %s3043_s2 = inlined_call_operand.hbm [shape: bf16[2,128,128], index: 2, kind: input, shape index: {}]   ;;  %s3044_s3 = inlined_call_operand.hbm [shape: f32[2,8,128], index: 3, kind: input, shape index: {}]   ;;  %s3045_s4 = inlined_call_operand.hbm [shape: f32[16,32], index: 4, kind: output, shape index: {}]  }
   0x1   :  { %10 = vsyncpa [#allocation6], 0 }
   0x2   :  { %11 = vsyncpa [#allocation9], 0 }
   0x3   :  { %12 = vsyncpa [#allocation4], 0  ;;  %s2538_s15 = smov [#allocation5]   ;;  %s2539_s17 = smov [#allocation2]  }
   0x4   :  { %s30_s16 = sshll.u32 %s2538_s15, 4  ;;  %s18_s18 = sshll.u32 %s2539_s17, 4  ;;  %s31_s16 = int_to_ptr.vmem [resolvable:$true] %s30_s16  ;;  %s2588_s18 = int_to_ptr.vmem [resolvable:$true] %s18_s18 }
   0x5   :  { %s2420_s21 = scalar_lea.hbm %s3042_s1, 256 }
   0x6   :  { %p2421_p0 = scmp.ne.s32.totalorder %s3042_s1, %s2420_s21  ;;  %p2424_p1 = scmp.lt.u32.totalorder %s2420_s21, %s3042_s1 }
   0x8   :  { %p2426_p2 = pnand %p2424_p1, %p2421_p0 }
   0xa   :  { %2429 = shalt.err (!%p2426_p2)
}
   0xb   :  { %s2430_s26 = scalar_lea.vmem %s31_s16, 256  ;;  %p2435_p4 = scmp.lt.s32.totalorder %s31_s16, %s31_s16 }
   0xc   :  { %p2431_p3 = scmp.ne.s32.totalorder %s31_s16, %s2430_s26  ;;  %p2436_p5 = scmp.lt.s32.totalorder %s2430_s26, %s2430_s26 }
   0xe   :  { %p2437_p6 = por %p2436_p5, %p2435_p4 }
  0x10   :  { %p2438_p7 = pnand %p2437_p6, %p2431_p3 }
  0x12   :  { %2441 = shalt.err (!%p2438_p7)
}
  0x13   :  { %s2540_s27 = smov 128   ;;  %s2541_s28 = smov 8  }
  0x14   :  { %36 = dma.hbm_to_vmem [thread:$0]  %s3042_s1, 256, %s31_s16, [#allocation6], %s2540_s27, %s2540_s27, %s2541_s28  }
  0x15   :  { %s2442_s7 = scalar_lea.hbm %s3041_s0, 256 }
  0x16   :  { %p2443_p8 = scmp.ne.s32.totalorder %s3041_s0, %s2442_s7  ;;  %p2446_p9 = scmp.lt.u32.totalorder %s2442_s7, %s3041_s0 }
  0x18   :  { %p2448_p10 = pnand %p2446_p9, %p2443_p8 }
  0x1a   :  { %2451 = shalt.err (!%p2448_p10)
}
  0x1b   :  { %s2452_s12 = scalar_lea.vmem %s2588_s18, 256  ;;  %p2457_p12 = scmp.lt.s32.totalorder %s2588_s18, %s2588_s18 }
  0x1c   :  { %p2453_p11 = scmp.ne.s32.totalorder %s2588_s18, %s2452_s12  ;;  %p2458_p13 = scmp.lt.s32.totalorder %s2452_s12, %s2452_s12 }
  0x1e   :  { %p2459_p0 = por %p2458_p13, %p2457_p12 }
  0x20   :  { %p2460_p1 = pnand %p2459_p0, %p2453_p11 }
  0x22   :  { %2463 = shalt.err (!%p2460_p1)
}
  0x23   :  { %24 = dma.hbm_to_vmem [thread:$0]  %s3041_s0, 256, %s2588_s18, [#allocation3], %s2540_s27, %s2540_s27, %s2541_s28  }
  0x24   :  { %s2542_s14 = smov [#allocation7]   ;;  %s2464_s19 = scalar_lea.hbm %s3043_s2, 2048 }
  0x25   :  { %s42_s15 = sshll.u32 %s2542_s14, 4  ;;  %p2465_p2 = scmp.ne.s32.totalorder %s3043_s2, %s2464_s19  ;;  %s43_s15 = int_to_ptr.vmem [resolvable:$true] %s42_s15 }
  0x26   :  { %p2468_p3 = scmp.lt.u32.totalorder %s2464_s19, %s3043_s2 }
  0x28   :  { %p2470_p4 = pnand %p2468_p3, %p2465_p2 }
  0x2a   :  { %2473 = shalt.err (!%p2470_p4)
}
  0x2b   :  { %s2474_s24 = scalar_lea.vmem %s43_s15, 2048  ;;  %p2479_p6 = scmp.lt.s32.totalorder %s43_s15, %s43_s15 }
  0x2c   :  { %p2475_p5 = scmp.ne.s32.totalorder %s43_s15, %s2474_s24  ;;  %p2480_p7 = scmp.lt.s32.totalorder %s2474_s24, %s2474_s24 }
  0x2e   :  { %p2481_p8 = por %p2480_p7, %p2479_p6 }
  0x30   :  { %p2482_p9 = pnand %p2481_p8, %p2475_p5 }
  0x32   :  { %2485 = shalt.err (!%p2482_p9)
}
  0x33   :  { %s2543_s0 = smov 64   ;;  %s2544_s18 = smov 4  }
  0x34   :  { %48 = dma.hbm_to_vmem [thread:$0]  %s3043_s2, 2048, %s43_s15, [#allocation6], %s2543_s0, %s2543_s0, %s2544_s18  }
  0x35   :  { %s2545_s29 = smov [#allocation8]   ;;  %s2486_s7 = scalar_lea.hbm %s3044_s3, 256 }
  0x36   :  { %s54_s30 = sshll.u32 %s2545_s29, 4  ;;  %p2487_p10 = scmp.ne.s32.totalorder %s3044_s3, %s2486_s7  ;;  %s55_s30 = int_to_ptr.vmem [resolvable:$true] %s54_s30 }
  0x37   :  { %p2490_p11 = scmp.lt.u32.totalorder %s2486_s7, %s3044_s3 }
  0x39   :  { %p2492_p12 = pnand %p2490_p11, %p2487_p10 }
  0x3b   :  { %2495 = shalt.err (!%p2492_p12)
}
  0x3c   :  { %s2496_s12 = scalar_lea.vmem %s55_s30, 256  ;;  %p2501_p0 = scmp.lt.s32.totalorder %s55_s30, %s55_s30 }
  0x3d   :  { %p2497_p13 = scmp.ne.s32.totalorder %s55_s30, %s2496_s12  ;;  %p2502_p1 = scmp.lt.s32.totalorder %s2496_s12, %s2496_s12 }
  0x3f   :  { %p2503_p2 = por %p2502_p1, %p2501_p0 }
  0x41   :  { %p2504_p3 = pnand %p2503_p2, %p2497_p13 }
  0x43   :  { %2507 = shalt.err (!%p2504_p3)
}
  0x44   :  { %60 = dma.hbm_to_vmem [thread:$0]  %s3044_s3, 256, %s55_s30, [#allocation9], %s2540_s27, %s2540_s27, %s2541_s28  }
  0x45   :  { %2530 = dma.done.wait [#allocation3], 256  }
  0x46   :  { %2531 = vsyncadd [#allocation3], 4294967040 }
  0x47   :  { %2532 = dma.done.wait [#allocation6], 2304  }
  0x48   :  { %2533 = vsyncadd [#allocation6], 4294964992 }
  0x49   :  { %2534 = dma.done.wait [#allocation9], 256  }
  0x4a   :  { %2535 = vsyncadd [#allocation9], 4294967040  ;;  %v2546_v0 = vmov 0.0   ;;  %vm2547_vm0 = vmmov 0   ;;  %v2660_v1 = vld [vmem:[#allocation7] sm:$0xff]   ;;  %v2662_v2 = vld [vmem:[#allocation7 + $0x8] sm:$0xff]   ;;  %v80_v10 = vlaneseq }
  0x4b   :  { %2101 = vmatprep.subr.bf16.mxu1 %v2546_v0  ;;  %2105 = vmatprep.mubr.msk.bf16.mxu1 %vm2547_vm0, %v2546_v0  ;;  %v74_v3 = vld [vmem:[#allocation2] sm:$0xff]  ;;  %v75_v4 = vld [vmem:[#allocation2 + $0x8] sm:$0xff]  ;;  %v76_v5 = vld [vmem:[#allocation5] sm:$0xff]  ;;  %vm249_vm1 = vcmask 261120   ;;  %s2548_s3 = smov 80   ;;  %s2549_s13 = smov 96  }
  0x4c   :  { %2115 = vmatprep.subr.bf16.mxu0 %v2546_v0  ;;  %2117 = vmatprep.mubr.msk.bf16.mxu0 %vm2547_vm0, %v2546_v0  ;;  %v77_v6 = vld [vmem:[#allocation5 + $0x8] sm:$0xff]  ;;  %v2666_v7 = vadd.f32 %v76_v5, %v74_v3  ;;  %v2677_v11 = vshrl.u32 %v80_v10, 7  ;;  %v2680_v13 = vld [vmem:[#allocation8] sm:$0xff]  ;;  %s2550_s14 = smov 120   ;;  %s2551_s15 = smov 88   ;;  %vm298_vm2 = vcmask 64512  }
  0x4d   :  { %2102 = vmatpush3.bf16.msra.mxu1 %v2660_v1  ;;  %v2668_v8 = vadd.f32 %v77_v6, %v75_v4  ;;  %s2552_s16 = smov 112   ;;  %s2553_s17 = smov 72   ;;  %v186_v33 = vand.u32 127, %v80_v10  ;;  %v2555_v44 = vmov -1e+30   ;;  %vm507_vm6 = vcmask 130048  }
  0x4e   :  { %2103 = vmatprep.subr.bf16.mxu1 %v2546_v0  ;;  %v235_v12 = vsub.s32 0, %v2677_v11  ;;  %s2554_s19 = smov 104   ;;  %v82_v34 = vadd.s32 8, %v2677_v11  ;;  %v93_v35 = vand.u32 1, %v2677_v11  ;;  %v83_v37 = vadd.s32 16, %v2677_v11  ;;  %s2556_s20 = smov 56  }
  0x4f   :  { %v232_v9 = vpack.c.bf16 %v2668_v8, %v2666_v7  ;;  %v191_v36 = vand.u32 1, %v186_v33  ;;  %v84_v39 = vadd.s32 24, %v2677_v11  ;;  %v85_v41 = vadd.s32 32, %v2677_v11  ;;  %s2557_s21 = smov 48   ;;  %s2558_s22 = smov 40  }
  0x50   :  { %v236_v14 = vrot.slane %v2680_v13, %v235_v12  ;;  %v100_v38 = vand.u32 1, %v82_v34  ;;  %v107_v40 = vand.u32 1, %v83_v37  ;;  %v86_v43 = vadd.s32 40, %v2677_v11  ;;  %s2559_s23 = smov 32   ;;  %s2560_s24 = smov 16  }
  0x51   :  { %2104 = vmatpush3.bf16.msra.mxu1 %v2662_v2  ;;  %vm199_vm3 = vcmp.eq.s32.totalorder %v93_v35, %v191_v36  ;;  %v114_v42 = vand.u32 1, %v84_v39  ;;  %v121_v46 = vand.u32 1, %v85_v41  ;;  %v87_v47 = vadd.s32 48, %v2677_v11  ;;  %s2561_s18 = smov 24  }
  0x52   :  { %2109 = vmatprep.subr.bf16.mxu1 %v2546_v0  ;;  %vm200_vm4 = vcmp.eq.s32.totalorder %v100_v38, %v191_v36  ;;  %v2728_v45 = vsel %vm199_vm3, 0.0, %v2555_v44  ;;  %vm201_vm5 = vcmp.eq.s32.totalorder %v107_v40, %v191_v36  ;;  %v128_v52 = vand.u32 1, %v86_v43 }
  0x53   :  { %v2731_v49 = vsel %vm200_vm4, 0.0, %v2555_v44  ;;  %vm202_vm7 = vcmp.eq.s32.totalorder %v114_v42, %v191_v36  ;;  %v88_v53 = vadd.s32 56, %v2677_v11  ;;  %v2735_v55 = vsel %vm201_vm5, 0.0, %v2555_v44 }
  0x54   :  { %2106 = vmatmul.mubr.msk.bf16.vlgmr.msra.gmra.mrb[0].mxu1 %vm249_vm1, %v232_v9  ;;  %vm203_vm8 = vcmp.eq.s32.totalorder %v121_v46, %v191_v36  ;;  %v135_v59 = vand.u32 1, %v87_v47  ;;  %v2739_v61 = vsel %vm202_vm7, 0.0, %v2555_v44  ;;  %vm204_vm9 = vcmp.eq.s32.totalorder %v128_v52, %v191_v36 }
  0x55   :  { %2111 = vmatprep.mubr.msk.bf16.mxu1 %vm2547_vm0, %v2546_v0  ;;  %v142_v4 = vand.u32 1, %v88_v53  ;;  %v2743_v6 = vsel %vm203_vm8, 0.0, %v2555_v44  ;;  %vm816_vm12 = vcmask 195584   ;;  %vm1010_vm13 = vcmask 523264  }
  0x56   :  { %vm205_vm10 = vcmp.eq.s32.totalorder %v135_v59, %v191_v36 }
  0x57   :  { %vm206_vm11 = vcmp.eq.s32.totalorder %v142_v4, %v191_v36 }
 0x127   :  { %v287_v15 = vpop.f32.mrb[0].mxu1 }
 0x128   :  { %v2107_v16 = vpop.f32.mrb[1].mxu1  ;;  %v288_v18 = vadd.f32 %v287_v15, %v236_v14  ;;  %v2746_v15 = vsel %vm204_vm9, 0.0, %v2555_v44 }
 0x129   :  { %v290_v17 = vpop.f32.mrb[2].mxu1 }
 0x12a   :  { %v291_v19 = vadd.f32 %v290_v17, %v236_v14  ;;  %v2108_v20 = vpop.f32.mrb[3].mxu1 }
 0x12c   :  { %v2685_v21 = vpack.c.bf16 %v291_v19, %v288_v18 }
 0x12e   :  { %399 = vrot.lane.b32.xlu1 %v2685_v21, %s2548_s3  ;;  %296 = vrot.lane.b32.xlu0 %v2685_v21, %s2549_s13 }
 0x132   :  { %346 = vrot.lane.b32.xlu1 %v2685_v21, %s2550_s14  ;;  %348 = vrot.lane.b32.xlu0 %v2685_v21, %s2551_s15 }
 0x136   :  { %397 = vrot.lane.b32.xlu1 %v2685_v21, %s2552_s16  ;;  %450 = vrot.lane.b32.xlu0 %v2685_v21, %s2553_s17 }
 0x13a   :  { %448 = vrot.lane.b32.xlu0 %v2685_v21, %s2554_s19 }
 0x1a0   :  { %v297_v22 = vpop.permute.xlu0 %296  ;;  %v400_v24 = vpop.permute.xlu1 %399 }
 0x1a1   :  { %v303_v23 = vsel %vm298_vm2, %v297_v22, 0  ;;  %v405_v27 = vsel %vm298_vm2, %v400_v24, 0  ;;  %v2751_v22 = vsel %vm205_vm10, 0.0, %v2555_v44 }
 0x1a2   :  { %2110 = vmatpush3.bf16.xpose.msra.mxu1 %v303_v23 }
 0x1a3   :  { %2121 = vmatprep.subr.bf16.mxu1 %v2546_v0 }
 0x1a4   :  { %v349_v25 = vpop.permute.xlu0 %348  ;;  %v347_v28 = vpop.permute.xlu1 %346 }
 0x1a5   :  { %v354_v26 = vsel %vm298_vm2, %v349_v25, 0 }
 0x1a6   :  { %2116 = vmatpush3.bf16.xpose.msra.mxu0 %v354_v26  ;;  %v2754_v26 = vsel %vm206_vm11, 0.0, %v2555_v44 }
 0x1a7   :  { %2127 = vmatprep.subr.bf16.mxu0 %v2546_v0 }
 0x1a8   :  { %v451_v29 = vpop.permute.xlu0 %450  ;;  %v398_v31 = vpop.permute.xlu1 %397 }
 0x1a9   :  { %2112 = vmatmul.mubr.msk.bf16.vlgmr.msra.gmra.mrb[4].mxu1 %vm298_vm2, %v2685_v21  ;;  %v456_v30 = vsel %vm298_vm2, %v451_v29, 0 }
 0x1aa   :  { %2122 = vmatpush3.bf16.xpose.msra.mxu1 %v405_v27  ;;  %2123 = vmatprep.mubr.msk.bf16.mxu1 %vm2547_vm0, %v2546_v0 }
 0x1ab   :  { %2133 = vmatprep.subr.bf16.mxu1 %v2546_v0 }
 0x1ac   :  { %v449_v32 = vpop.permute.xlu0 %448 }
 0x1ad   :  { %2118 = vmatmul.mubr.msk.bf16.vlgmr.msra.gmra.mrb[0].mxu0 %vm298_vm2, %v347_v28 }
 0x1ae   :  { %2128 = vmatpush3.bf16.xpose.msra.mxu0 %v456_v30  ;;  %2129 = vmatprep.mubr.msk.bf16.mxu0 %vm2547_vm0, %v2546_v0 }
 0x1af   :  { %2139 = vmatprep.subr.bf16.mxu0 %v2546_v0 }
 0x1b1   :  { %2124 = vmatmul.mubr.msk.bf16.vlgmr.msra.gmra.mrb[8].mxu1 %vm298_vm2, %v398_v31 }
 0x1b2   :  { %2135 = vmatprep.mubr.msk.bf16.mxu1 %vm2547_vm0, %v2546_v0 }
 0x1b5   :  { %2130 = vmatmul.mubr.msk.bf16.vlgmr.msra.gmra.mrb[4].mxu0 %vm298_vm2, %v449_v32 }
 0x1b6   :  { %2141 = vmatprep.mubr.msk.bf16.mxu0 %vm2547_vm0, %v2546_v0 }
 0x27c   :  { %v339_v48 = vpop.f32.mrb[4].mxu1 }
 0x27d   :  { %v499_v50 = vadd.f32 %v339_v48, %v2728_v45  ;;  %v2113_v51 = vpop.f32.mrb[5].mxu1 }
 0x27e   :  { %v342_v54 = vpop.f32.mrb[6].mxu1 }
 0x27f   :  { %v500_v56 = vadd.f32 %v342_v54, %v2731_v49  ;;  %v2114_v57 = vpop.f32.mrb[7].mxu1  ;;  %v508_v58 = vsel %vm507_vm6, %v499_v50, -inf }
 0x280   :  { %v390_v60 = vpop.f32.mrb[0].mxu0  ;;  %509 = vmax.xlane.f32.xlu1 %v508_v58 }
 0x281   :  { %v501_v62 = vadd.f32 %v390_v60, %v2735_v55  ;;  %v2119_v63 = vpop.f32.mrb[1].mxu0  ;;  %v511_v3 = vsel %vm507_vm6, %v500_v56, -inf }
 0x282   :  { %v393_v5 = vpop.f32.mrb[2].mxu0  ;;  %512 = vmax.xlane.f32.xlu0 %v511_v3 }
 0x283   :  { %v502_v9 = vadd.f32 %v393_v5, %v2739_v61  ;;  %v2120_v10 = vpop.f32.mrb[3].mxu0  ;;  %v514_v19 = vsel %vm507_vm6, %v501_v62, -inf }
 0x284   :  { %v441_v14 = vpop.f32.mrb[8].mxu1 }
 0x285   :  { %v503_v16 = vadd.f32 %v441_v14, %v2743_v6  ;;  %v2125_v17 = vpop.f32.mrb[9].mxu1  ;;  %v517_v18 = vsel %vm507_vm6, %v502_v9, -inf }
 0x286   :  { %518 = vmax.xlane.f32.xlu1 %v517_v18  ;;  %515 = vmax.xlane.f32.xlu0 %v514_v19  ;;  %v444_v20 = vpop.f32.mrb[10].mxu1 }
 0x287   :  { %v504_v23 = vadd.f32 %v444_v20, %v2746_v15  ;;  %v2126_v24 = vpop.f32.mrb[11].mxu1  ;;  %v520_v29 = vsel %vm507_vm6, %v503_v16, -inf }
 0x288   :  { %v492_v25 = vpop.f32.mrb[4].mxu0 }
 0x289   :  { %v505_v27 = vadd.f32 %v492_v25, %v2751_v22  ;;  %v2131_v28 = vpop.f32.mrb[5].mxu0  ;;  %v523_v30 = vsel %vm507_vm6, %v504_v23, -inf }
 0x28a   :  { %v495_v31 = vpop.f32.mrb[6].mxu0  ;;  %521 = vmax.xlane.f32.xlu0 %v520_v29  ;;  %524 = vmax.xlane.f32.xlu1 %v523_v30 }
 0x28b   :  { %v506_v32 = vadd.f32 %v495_v31, %v2754_v26  ;;  %v2132_v33 = vpop.f32.mrb[7].mxu0  ;;  %v526_v34 = vsel %vm507_vm6, %v505_v27, -inf }
 0x28d   :  { %v529_v35 = vsel %vm507_vm6, %v506_v32, -inf }
 0x28e   :  { %527 = vmax.xlane.f32.xlu0 %v526_v34  ;;  %530 = vmax.xlane.f32.xlu1 %v529_v35 }
 0x29f   :  { %647 = vrot.lane.b32.xlu1 %v2685_v21, %s2556_s20 }
 0x2a4   :  { %600 = vrot.lane.b32.xlu0 %v2685_v21, %s2543_s0 }
 0x30d   :  { %v510_v36 = vpop.xlane.xlu1 %509 }
 0x30e   :  { %v532_v37 = vsub.f32 %v499_v50, %v510_v36 }
 0x30f   :  { %v513_v38 = vpop.xlane.xlu0 %512 }
 0x310   :  { %v540_v39 = vmul.f32 1.442695, %v532_v37  ;;  %v533_v40 = vsub.f32 %v500_v56, %v513_v38 }
 0x312   :  { %2340 = vpow2.f32 %v540_v39  ;;  %v542_v41 = vmul.f32 1.442695, %v533_v40 }
 0x313   :  { %v519_v42 = vpop.xlane.xlu1 %518  ;;  %v516_v43 = vpop.xlane.xlu0 %515 }
 0x314   :  { %2342 = vpow2.f32 %v542_v41  ;;  %v535_v44 = vsub.f32 %v502_v9, %v519_v42  ;;  %v534_v46 = vsub.f32 %v501_v62, %v516_v43 }
 0x316   :  { %v546_v47 = vmul.f32 1.442695, %v535_v44  ;;  %v544_v48 = vmul.f32 1.442695, %v534_v46 }
 0x317   :  { %v522_v51 = vpop.xlane.xlu0 %521  ;;  %v525_v52 = vpop.xlane.xlu1 %524 }
 0x318   :  { %2344 = vpow2.f32 %v546_v47  ;;  %v536_v53 = vsub.f32 %v503_v16, %v522_v51  ;;  %v537_v54 = vsub.f32 %v504_v23, %v525_v52 }
 0x319   :  { %2346 = vpow2.f32 %v544_v48 }
 0x31a   :  { %v548_v57 = vmul.f32 1.442695, %v536_v53  ;;  %v550_v50 = vmul.f32 1.442695, %v537_v54 }
 0x31b   :  { %v528_v58 = vpop.xlane.xlu0 %527  ;;  %v531_v59 = vpop.xlane.xlu1 %530 }
 0x31c   :  { %v2341_v56 = vpop.eup %2340  ;;  %2348 = vpow2.f32 %v548_v57  ;;  %v538_v60 = vsub.f32 %v505_v27, %v528_v58  ;;  %v539_v63 = vsub.f32 %v506_v32, %v531_v59 }
 0x31d   :  { %2350 = vpow2.f32 %v550_v50  ;;  %v556_v3 = vsel %vm507_vm6, %v2341_v56, 0.0 }
 0x31e   :  { %v2343_v62 = vpop.eup %2342  ;;  %v552_v4 = vmul.f32 1.442695, %v538_v60  ;;  %v554_v5 = vmul.f32 1.442695, %v539_v63  ;;  %557 = vadd.xlane.f32.xlu0 %v556_v3 }
 0x31f   :  { %v601_v9 = vpop.permute.xlu0 %600  ;;  %v648_v10 = vpop.permute.xlu1 %647  ;;  %v559_v14 = vsel %vm507_vm6, %v2343_v62, 0.0 }
 0x320   :  { %2352 = vpow2.f32 %v552_v4  ;;  %2134 = vmatpush3.bf16.msra.mxu1 %v601_v9  ;;  %560 = vadd.xlane.f32.xlu1 %v559_v14 }
 0x321   :  { %2354 = vpow2.f32 %v554_v5  ;;  %2140 = vmatpush3.bf16.msra.mxu0 %v648_v10  ;;  %2145 = vmatprep.subr.bf16.mxu1 %v2546_v0 }
 0x322   :  { %v2345_v16 = vpop.eup %2344  ;;  %2151 = vmatprep.subr.bf16.mxu0 %v2546_v0 }
 0x323   :  { %v2347_v17 = vpop.eup %2346  ;;  %v565_v18 = vsel %vm507_vm6, %v2345_v16, 0.0 }
 0x324   :  { %v562_v19 = vsel %vm507_vm6, %v2347_v17, 0.0  ;;  %566 = vadd.xlane.f32.xlu1 %v565_v18 }
 0x325   :  { %563 = vadd.xlane.f32.xlu0 %v562_v19 }
 0x326   :  { %v2349_v20 = vpop.eup %2348 }
 0x327   :  { %v2351_v23 = vpop.eup %2350  ;;  %v568_v24 = vsel %vm507_vm6, %v2349_v20, 0.0 }
 0x328   :  { %v571_v25 = vsel %vm507_vm6, %v2351_v23, 0.0 }
 0x329   :  { %569 = vadd.xlane.f32.xlu0 %v568_v24  ;;  %572 = vadd.xlane.f32.xlu1 %v571_v25 }
 0x32a   :  { %v2353_v27 = vpop.eup %2352 }
 0x32b   :  { %v2355_v28 = vpop.eup %2354  ;;  %v574_v29 = vsel %vm507_vm6, %v2353_v27, 0.0 }
 0x32c   :  { %v577_v30 = vsel %vm507_vm6, %v2355_v28, 0.0 }
 0x32d   :  { %575 = vadd.xlane.f32.xlu0 %v574_v29  ;;  %578 = vadd.xlane.f32.xlu1 %v577_v30 }
 0x33e   :  { %694 = vrot.lane.b32.xlu1 %v2685_v21, %s2557_s21 }
 0x342   :  { %824 = vrot.lane.b32.xlu1 %v2660_v1, %s2559_s23 }
 0x343   :  { %741 = vrot.lane.b32.xlu0 %v2685_v21, %s2558_s22 }
 0x3ab   :  { %v558_v31 = vpop.xlane.xlu0 %557 }
 0x3ac   :  { %2356 = vrcp.f32 %v558_v31 }
 0x3ad   :  { %v561_v32 = vpop.xlane.xlu1 %560 }
 0x3ae   :  { %2358 = vrcp.f32 %v561_v32 }
 0x3b1   :  { %v567_v33 = vpop.xlane.xlu1 %566 }
 0x3b2   :  { %v564_v34 = vpop.xlane.xlu0 %563  ;;  %2360 = vrcp.f32 %v567_v33 }
 0x3b3   :  { %2362 = vrcp.f32 %v564_v34 }
 0x3b6   :  { %v2357_v35 = vpop.eup %2356  ;;  %v570_v36 = vpop.xlane.xlu0 %569 }
 0x3b7   :  { %v573_v37 = vpop.xlane.xlu1 %572  ;;  %2364 = vrcp.f32 %v570_v36  ;;  %v588_v39 = vmul.f32 %v2357_v35, %v2341_v56 }
 0x3b8   :  { %v2359_v38 = vpop.eup %2358  ;;  %2366 = vrcp.f32 %v573_v37 }
 0x3b9   :  { %v589_v40 = vmul.f32 %v2359_v38, %v2343_v62 }
 0x3ba   :  { %v576_v41 = vpop.xlane.xlu0 %575 }
 0x3bb   :  { %v579_v42 = vpop.xlane.xlu1 %578  ;;  %2368 = vrcp.f32 %v576_v41  ;;  %v596_v21 = vpack.c.bf16 %v589_v40, %v588_v39 }
 0x3bc   :  { %v2361_v43 = vpop.eup %2360  ;;  %2370 = vrcp.f32 %v579_v42 }
 0x3bd   :  { %v2363_v44 = vpop.eup %2362  ;;  %v591_v46 = vmul.f32 %v2361_v43, %v2345_v16  ;;  %2136 = vmatmul.mubr.msk.bf16.vlgmr.msra.gmra.mrb[12].mxu1 %vm507_vm6, %v596_v21 }
 0x3be   :  { %v590_v47 = vmul.f32 %v2363_v44, %v2347_v17  ;;  %2147 = vmatprep.mubr.msk.bf16.mxu1 %vm2547_vm0, %v2546_v0  ;;  %v742_v57 = vpop.permute.xlu0 %741 }
 0x3bf   :  { %v695_v48 = vpop.permute.xlu1 %694 }
 0x3c0   :  { %2146 = vmatpush3.bf16.msra.mxu1 %v695_v48  ;;  %v597_v51 = vpack.c.bf16 %v591_v46, %v590_v47  ;;  %v822_v48 = vsub.s32 1, %v2677_v11 }
 0x3c1   :  { %2157 = vmatprep.subr.bf16.mxu1 %v2546_v0  ;;  %v2365_v52 = vpop.eup %2364 }
 0x3c2   :  { %v2367_v53 = vpop.eup %2366  ;;  %v592_v54 = vmul.f32 %v2365_v52, %v2349_v20  ;;  %2142 = vmatmul.mubr.msk.bf16.vlgmr.msra.gmra.mrb[8].mxu0 %vm507_vm6, %v597_v51  ;;  %v823_v51 = vrot.slane %v2680_v13, %v822_v48 }
 0x3c3   :  { %v593_v50 = vmul.f32 %v2367_v53, %v2351_v23  ;;  %2152 = vmatpush3.bf16.msra.mxu0 %v742_v57  ;;  %2153 = vmatprep.mubr.msk.bf16.mxu0 %vm2547_vm0, %v2546_v0  ;;  %v825_v62 = vpop.permute.xlu1 %824 }
 0x3c4   :  { %2165 = vmatprep.subr.bf16.mxu0 %v2546_v0 }
 0x3c5   :  { %v2369_v58 = vpop.eup %2368  ;;  %v598_v59 = vpack.c.bf16 %v593_v50, %v592_v54 }
 0x3c6   :  { %v2371_v56 = vpop.eup %2370  ;;  %v594_v60 = vmul.f32 %v2369_v58, %v2353_v27 }
 0x3c7   :  { %v595_v63 = vmul.f32 %v2371_v56, %v2355_v28  ;;  %2148 = vmatmul.mubr.msk.bf16.vlgmr.msra.gmra.mrb[16].mxu1 %vm507_vm6, %v598_v59 }
 0x3c8   :  { %2161 = vmatprep.mubr.msk.bf16.mxu1 %vm2547_vm0, %v2546_v0  ;;  %2158 = vmatpush3.bf16.msra.mxu1 %v825_v62 }
 0x3c9   :  { %v599_v3 = vpack.c.bf16 %v595_v63, %v594_v60  ;;  %2159 = vmatprep.subr.bf16.mxu1 %v2546_v0 }
 0x3cb   :  { %2154 = vmatmul.mubr.msk.bf16.vlgmr.msra.gmra.mrb[12].mxu0 %vm507_vm6, %v599_v3 }
 0x3cc   :  { %2169 = vmatprep.mubr.msk.bf16.mxu0 %vm2547_vm0, %v2546_v0 }
 0x490   :  { %v640_v4 = vpop.f32.mrb[12].mxu1 }
 0x491   :  { %v2137_v5 = vpop.f32.mrb[13].mxu1 }
 0x492   :  { %v643_v9 = vpop.f32.mrb[14].mxu1 }
 0x493   :  { %v2138_v10 = vpop.f32.mrb[15].mxu1 }
 0x494   :  { %v2329_v10 = vld [vmem:[#allocation7 + $0x28] sm:$0xff]  }
 0x495   :  { %v687_v14 = vpop.f32.mrb[8].mxu0 }
 0x496   :  { %v2143_v16 = vpop.f32.mrb[9].mxu0 }
 0x497   :  { %v690_v17 = vpop.f32.mrb[10].mxu0 }
 0x498   :  { %v2294_v18 = vpack.i.bf16 %v690_v17, %v687_v14  ;;  %v2144_v19 = vpop.f32.mrb[11].mxu0 }
 0x49a   :  { %v734_v20 = vpop.f32.mrb[16].mxu1  ;;  %2295 = vrot.lane.b32.xlu0 %v2294_v18, %s2541_s28 }
 0x49b   :  { %v2149_v23 = vpop.f32.mrb[17].mxu1 }
 0x49c   :  { %v737_v24 = vpop.f32.mrb[18].mxu1 }
 0x49d   :  { %v2299_v25 = vpack.i.bf16 %v737_v24, %v734_v20  ;;  %v2150_v1 = vpop.f32.mrb[19].mxu1 }
 0x49e   :  { %v781_v27 = vpop.f32.mrb[12].mxu0 }
 0x49f   :  { %v2155_v28 = vpop.f32.mrb[13].mxu0  ;;  %2300 = vrot.lane.b32.xlu1 %v2299_v25, %s2560_s24 }
 0x4a0   :  { %v784_v29 = vpop.f32.mrb[14].mxu0 }
 0x4a1   :  { %v2304_v30 = vpack.i.bf16 %v784_v29, %v781_v27  ;;  %v2156_v31 = vpop.f32.mrb[15].mxu0 }
 0x4a2   :  { %v908_v31 = vsub.s32 4, %v2677_v11 }
 0x4a3   :  { %2305 = vrot.lane.b32.xlu0 %v2304_v30, %s2561_s18  ;;  %826 = vrot.lane.b32.xlu1 %v2662_v2, %s2559_s23 }
 0x50c   :  { %v2296_v32 = vpop.permute.xlu0 %2295 }
 0x50d   :  { %v2298_v34 = vunpack.i.h.bf16 %v2296_v32  ;;  %v2297_v35 = vunpack.i.l.bf16 %v2296_v32 }
 0x50f   :  { %v812_v40 = vsel %vm298_vm2, %v640_v4, %v2297_v35  ;;  %v813_v41 = vsel %vm298_vm2, %v643_v9, %v2298_v34  ;;  %v2326_v9 = vld [vmem:[#allocation7 + $0x10] sm:$0xff]   ;;  %v909_v35 = vrot.slane %v2680_v13, %v908_v31 }
 0x510   :  { %2166 = vmatpush3.bf16.msra.mxu0 %v2326_v9 }
 0x511   :  { %v2301_v33 = vpop.permute.xlu1 %2300  ;;  %2167 = vmatprep.subr.bf16.mxu0 %v2546_v0 }
 0x512   :  { %v2303_v36 = vunpack.i.h.bf16 %v2301_v33  ;;  %v2302_v37 = vunpack.i.l.bf16 %v2301_v33 }
 0x514   :  { %v815_v43 = vsel %vm507_vm6, %v813_v41, %v2303_v36  ;;  %v814_v2 = vsel %vm507_vm6, %v812_v40, %v2302_v37  ;;  %v914_v36 = vsub.s32 5, %v2677_v11 }
 0x515   :  { %v2306_v38 = vpop.permute.xlu0 %2305  ;;  %v827_v39 = vpop.permute.xlu1 %826 }
 0x516   :  { %v2308_v42 = vunpack.i.h.bf16 %v2306_v38  ;;  %v2307_v21 = vunpack.i.l.bf16 %v2306_v38  ;;  %2160 = vmatpush3.bf16.msra.mxu1 %v827_v39  ;;  %v915_v41 = vrot.slane %v2680_v13, %v914_v36 }
 0x517   :  { %2173 = vmatprep.subr.bf16.mxu1 %v2546_v0 }
 0x518   :  { %v817_v44 = vsel %vm816_vm12, %v814_v2, %v2307_v21  ;;  %v818_v46 = vsel %vm816_vm12, %v815_v43, %v2308_v42 }
 0x519   :  { %v819_v47 = vpack.c.bf16 %v818_v46, %v817_v44  ;;  %v2330_v44 = vld [vmem:[#allocation7 + $0x30] sm:$0xff]   ;;  %v2331_v46 = vld [vmem:[#allocation7 + $0x38] sm:$0xff]  }
 0x51b   :  { %2162 = vmatmul.mubr.msk.bf16.vlgmr.msra.gmra.mrb[20].mxu1 %vm249_vm1, %v819_v47  ;;  %v921_v47 = vsub.s32 2, %v2677_v11 }
 0x51c   :  { %2181 = vmatprep.mubr.msk.bf16.mxu1 %vm2547_vm0, %v2546_v0 }
 0x5ee   :  { %v867_v52 = vpop.f32.mrb[20].mxu1 }
 0x5ef   :  { %v868_v53 = vadd.f32 %v867_v52, %v823_v51  ;;  %v2163_v54 = vpop.f32.mrb[21].mxu1 }
 0x5f0   :  { %v870_v57 = vpop.f32.mrb[22].mxu1 }
 0x5f1   :  { %v874_v50 = vadd.f32 %v868_v53, %v2666_v7  ;;  %v871_v58 = vadd.f32 %v870_v57, %v823_v51  ;;  %v2164_v59 = vpop.f32.mrb[23].mxu1  ;;  %v2327_v7 = vld [vmem:[#allocation7 + $0x18] sm:$0xff]   ;;  %v922_v51 = vrot.slane %v2680_v13, %v921_v47 }
 0x5f2   :  { %2168 = vmatpush3.bf16.msra.mxu0 %v2327_v7 }
 0x5f3   :  { %v875_v56 = vadd.f32 %v871_v58, %v2668_v8  ;;  %v876_v60 = vsel %vm249_vm1, %v874_v50, 0.0  ;;  %v882_v63 = vmul.f32 %v874_v50, %v874_v50  ;;  %2185 = vmatprep.subr.bf16.mxu0 %v2546_v0  ;;  %v2328_v8 = vld [vmem:[#allocation7 + $0x20] sm:$0xff]  }
 0x5f4   :  { %877 = vadd.xlane.f32.xlu0 %v876_v60  ;;  %2174 = vmatpush3.bf16.msra.mxu1 %v2328_v8 }
 0x5f5   :  { %v879_v3 = vsel %vm249_vm1, %v875_v56, 0.0  ;;  %v884_v62 = vsel %vm249_vm1, %v882_v63, 0.0  ;;  %v883_v4 = vmul.f32 %v875_v56, %v875_v56  ;;  %2175 = vmatprep.subr.bf16.mxu1 %v2546_v0  ;;  %v984_v63 = vsub.s32 3, %v2677_v11 }
 0x5f6   :  { %880 = vadd.xlane.f32.xlu1 %v879_v3 }
 0x5f7   :  { %v887_v5 = vsel %vm249_vm1, %v883_v4, 0.0  ;;  %v985_v3 = vrot.slane %v2680_v13, %v984_v63 }
 0x5f8   :  { %885 = vadd.xlane.f32.xlu0 %v884_v62  ;;  %2176 = vmatpush3.bf16.msra.mxu1 %v2329_v10 }
 0x5f9   :  { %2177 = vmatprep.subr.bf16.mxu1 %v2546_v0 }
 0x5fc   :  { %888 = vadd.xlane.f32.xlu0 %v887_v5  ;;  %2178 = vmatpush3.bf16.msra.mxu1 %v2330_v44 }
 0x5fd   :  { %2179 = vmatprep.subr.bf16.mxu1 %v2546_v0 }
 0x600   :  { %2180 = vmatpush3.bf16.msra.mxu1 %v2331_v46 }
 0x601   :  { %2199 = vmatprep.subr.bf16.mxu1 %v2546_v0 }
 0x681   :  { %v878_v14 = vpop.xlane.xlu0 %877 }
 0x682   :  { %v890_v16 = vmul.f32 0.03125, %v878_v14 }
 0x683   :  { %v881_v17 = vpop.xlane.xlu1 %880 }
 0x684   :  { %v894_v19 = vmul.f32 %v890_v16, %v890_v16  ;;  %v891_v20 = vmul.f32 0.03125, %v881_v17  ;;  %v898_v32 = vsub.f32 %v874_v50, %v890_v16 }
 0x685   :  { %v886_v18 = vpop.xlane.xlu0 %885 }
 0x686   :  { %v892_v23 = vmul.f32 0.03125, %v886_v18  ;;  %v895_v1 = vmul.f32 %v891_v20, %v891_v20  ;;  %v899_v37 = vsub.f32 %v875_v56, %v891_v20 }
 0x688   :  { %v896_v24 = vsub.f32 %v892_v23, %v894_v19 }
 0x689   :  { %v889_v25 = vpop.xlane.xlu0 %888 }
 0x68a   :  { %v900_v27 = vadd.f32 1e-05, %v896_v24  ;;  %v893_v28 = vmul.f32 0.03125, %v889_v25  ;;  %v2854_v24 = vld [vmem:[#allocation7 + $0x40] sm:$0xff]   ;;  %v2857_v25 = vld [vmem:[#allocation7 + $0x48] sm:$0xff]  }
 0x68c   :  { %2372 = vrsqrt.f32 %v900_v27  ;;  %v897_v29 = vsub.f32 %v893_v28, %v895_v1 }
 0x68e   :  { %v901_v30 = vadd.f32 1e-05, %v897_v29 }
 0x690   :  { %2374 = vrsqrt.f32 %v901_v30 }
 0x696   :  { %v2373_v33 = vpop.eup %2372 }
 0x697   :  { %v904_v34 = vmul.f32 %v2373_v33, %v898_v32 }
 0x699   :  { %v910_v40 = vmul.f32 %v909_v35, %v904_v34 }
 0x69a   :  { %v2375_v38 = vpop.eup %2374 }
 0x69b   :  { %v905_v39 = vmul.f32 %v2375_v38, %v899_v37  ;;  %v916_v21 = vadd.f32 %v915_v41, %v910_v40 }
 0x69d   :  { %v911_v42 = vmul.f32 %v909_v35, %v905_v39 }
 0x69f   :  { %v917_v43 = vadd.f32 %v915_v41, %v911_v42  ;;  %v1089_v42 = vsub.s32 6, %v2677_v11 }
 0x6a1   :  { %v918_v2 = vpack.c.bf16 %v917_v43, %v916_v21 }
 0x6a3   :  { %2170 = vmatmul.mubr.msk.bf16.vlgmr.msra.gmra.mrb[16].mxu0 %vm249_vm1, %v918_v2  ;;  %v1095_v2 = vsub.s32 7, %v2677_v11 }
 0x6a4   :  { %2189 = vmatprep.mubr.msk.bf16.mxu0 %vm2547_vm0, %v2546_v0  ;;  %2186 = vmatpush3.bf16.msra.mxu0 %v2854_v24 }
 0x6a5   :  { %2187 = vmatprep.subr.bf16.mxu0 %v2546_v0 }
 0x6a8   :  { %2188 = vmatpush3.bf16.msra.mxu0 %v2857_v25 }
 0x6a9   :  { %2193 = vmatprep.subr.bf16.mxu0 %v2546_v0 }
 0x776   :  { %v972_v52 = vpop.f32.mrb[16].mxu0 }
 0x777   :  { %v973_v53 = vadd.f32 %v972_v52, %v922_v51  ;;  %v2171_v54 = vpop.f32.mrb[17].mxu0 }
 0x778   :  { %v975_v57 = vpop.f32.mrb[18].mxu0 }
 0x779   :  { %v976_v50 = vadd.f32 %v975_v57, %v922_v51  ;;  %v2172_v58 = vpop.f32.mrb[19].mxu0  ;;  %v979_v59 = vmax.f32 %v973_v53, 0.0  ;;  %v1096_v57 = vrot.slane %v2680_v13, %v1095_v2 }
 0x77b   :  { %v980_v56 = vmax.f32 %v976_v50, 0.0 }
 0x77d   :  { %v981_v60 = vpack.c.bf16 %v980_v56, %v979_v59 }
 0x77f   :  { %2182 = vmatmul.mubr.msk.bf16.vlgmr.msra.gmra.mrb[24].mxu1 %vm1010_vm13, %v981_v60  ;;  %v2879_v60 = vld [vmem:[#allocation8 + $0x8] sm:$0xff] }
 0x780   :  { %2201 = vmatprep.mubr.msk.bf16.mxu1 %vm2547_vm0, %v2546_v0 }
 0x852   :  { %v1048_v62 = vpop.f32.mrb[24].mxu1 }
 0x853   :  { %v1049_v4 = vadd.f32 %v1048_v62, %v985_v3  ;;  %v2183_v5 = vpop.f32.mrb[25].mxu1 }
 0x854   :  { %v1051_v9 = vpop.f32.mrb[26].mxu1 }
 0x855   :  { %v1055_v7 = vadd.f32 %v1049_v4, %v916_v21  ;;  %v1052_v8 = vadd.f32 %v1051_v9, %v985_v3  ;;  %v2184_v10 = vpop.f32.mrb[27].mxu1  ;;  %v1122_v3 = vrot.slane %v2879_v60, %v235_v12 }
 0x857   :  { %v1056_v14 = vadd.f32 %v1052_v8, %v917_v43  ;;  %v1057_v16 = vsel %vm249_vm1, %v1055_v7, 0.0  ;;  %v1063_v17 = vmul.f32 %v1055_v7, %v1055_v7  ;;  %v1090_v43 = vrot.slane %v2680_v13, %v1089_v42 }
 0x858   :  { %1058 = vadd.xlane.f32.xlu1 %v1057_v16 }
 0x859   :  { %v1060_v18 = vsel %vm249_vm1, %v1056_v14, 0.0  ;;  %v1064_v19 = vmul.f32 %v1056_v14, %v1056_v14  ;;  %v1065_v20 = vsel %vm249_vm1, %v1063_v17, 0.0 }
 0x85a   :  { %1061 = vadd.xlane.f32.xlu0 %v1060_v18 }
 0x85b   :  { %v1068_v23 = vsel %vm249_vm1, %v1064_v19, 0.0 }
 0x85c   :  { %1066 = vadd.xlane.f32.xlu1 %v1065_v20 }
 0x85e   :  { %1069 = vadd.xlane.f32.xlu0 %v1068_v23 }
 0x8e5   :  { %v1059_v1 = vpop.xlane.xlu1 %1058 }
 0x8e6   :  { %v1071_v27 = vmul.f32 0.03125, %v1059_v1 }
 0x8e7   :  { %v1062_v28 = vpop.xlane.xlu0 %1061 }
 0x8e8   :  { %v1072_v29 = vmul.f32 0.03125, %v1062_v28  ;;  %v1075_v32 = vmul.f32 %v1071_v27, %v1071_v27  ;;  %v1079_v21 = vsub.f32 %v1055_v7, %v1071_v27 }
 0x8e9   :  { %v1067_v30 = vpop.xlane.xlu1 %1066 }
 0x8ea   :  { %v1073_v33 = vmul.f32 0.03125, %v1067_v30  ;;  %v1076_v35 = vmul.f32 %v1072_v29, %v1072_v29  ;;  %v1080_v46 = vsub.f32 %v1056_v14, %v1072_v29 }
 0x8eb   :  { %v1070_v34 = vpop.xlane.xlu0 %1069 }
 0x8ec   :  { %v1077_v37 = vsub.f32 %v1073_v33, %v1075_v32  ;;  %v1074_v38 = vmul.f32 0.03125, %v1070_v34 }
 0x8ee   :  { %v1081_v39 = vadd.f32 1e-05, %v1077_v37  ;;  %v1078_v40 = vsub.f32 %v1074_v38, %v1076_v35 }
 0x8f0   :  { %2376 = vrsqrt.f32 %v1081_v39  ;;  %v1082_v41 = vadd.f32 1e-05, %v1078_v40 }
 0x8f2   :  { %2378 = vrsqrt.f32 %v1082_v41 }
 0x8fa   :  { %v2377_v44 = vpop.eup %2376 }
 0x8fb   :  { %v1085_v51 = vmul.f32 %v2377_v44, %v1079_v21 }
 0x8fc   :  { %v2379_v52 = vpop.eup %2378 }
 0x8fd   :  { %v1086_v53 = vmul.f32 %v2379_v52, %v1080_v46  ;;  %v1091_v54 = vmul.f32 %v1090_v43, %v1085_v51 }
 0x8ff   :  { %v1092_v50 = vmul.f32 %v1090_v43, %v1086_v53  ;;  %v2870_v58 = vadd.f32 %v1096_v57, %v1091_v54 }
 0x901   :  { %v2872_v59 = vadd.f32 %v1096_v57, %v1092_v50 }
 0x903   :  { %v1118_v56 = vpack.c.bf16 %v2872_v59, %v2870_v58 }
 0x905   :  { %2190 = vmatmul.mubr.msk.bf16.vlgmr.msra.gmra.mrb[20].mxu0 %vm249_vm1, %v1118_v56 }
 0x906   :  { %2195 = vmatprep.mubr.msk.bf16.mxu0 %vm2547_vm0, %v2546_v0 }
 0x9d8   :  { %v1172_v13 = vpop.f32.mrb[20].mxu0 }
 0x9d9   :  { %v2191_v62 = vpop.f32.mrb[21].mxu0  ;;  %v1173_v5 = vadd.f32 %v1172_v13, %v1122_v3 }
 0x9da   :  { %v1175_v4 = vpop.f32.mrb[22].mxu0 }
 0x9db   :  { %v1176_v9 = vadd.f32 %v1175_v4, %v1122_v3  ;;  %v2192_v7 = vpop.f32.mrb[23].mxu0 }
 0x9dd   :  { %v2884_v8 = vpack.c.bf16 %v1176_v9, %v1173_v5 }
 0x9df   :  { %1232 = vrot.lane.b32.xlu0 %v2884_v8, %s2551_s15  ;;  %1181 = vrot.lane.b32.xlu1 %v2884_v8, %s2549_s13 }
 0x9e3   :  { %1334 = vrot.lane.b32.xlu0 %v2884_v8, %s2553_s17  ;;  %1283 = vrot.lane.b32.xlu1 %v2884_v8, %s2548_s3 }
 0x9e7   :  { %1332 = vrot.lane.b32.xlu0 %v2884_v8, %s2554_s19  ;;  %1230 = vrot.lane.b32.xlu1 %v2884_v8, %s2550_s14 }
 0x9eb   :  { %1281 = vrot.lane.b32.xlu1 %v2884_v8, %s2552_s16 }
 0xa51   :  { %v1233_v12 = vpop.permute.xlu0 %1232  ;;  %v1182_v10 = vpop.permute.xlu1 %1181 }
 0xa52   :  { %v1238_v14 = vsel %vm298_vm2, %v1233_v12, 0  ;;  %v1187_v16 = vsel %vm298_vm2, %v1182_v10, 0 }
 0xa53   :  { %2194 = vmatpush3.bf16.xpose.msra.mxu0 %v1187_v16  ;;  %2200 = vmatpush3.bf16.xpose.msra.mxu1 %v1238_v14 }
 0xa54   :  { %2205 = vmatprep.subr.bf16.mxu0 %v2546_v0  ;;  %2211 = vmatprep.subr.bf16.mxu1 %v2546_v0 }
 0xa55   :  { %v1284_v17 = vpop.permute.xlu1 %1283  ;;  %v1335_v18 = vpop.permute.xlu0 %1334 }
 0xa56   :  { %v1340_v20 = vsel %vm298_vm2, %v1335_v18, 0  ;;  %v1289_v23 = vsel %vm298_vm2, %v1284_v17, 0 }
 0xa59   :  { %v1231_v19 = vpop.permute.xlu1 %1230  ;;  %v1333_v1 = vpop.permute.xlu0 %1332 }
 0xa5a   :  { %2196 = vmatmul.mubr.msk.bf16.vlgmr.msra.gmra.mrb[24].mxu0 %vm298_vm2, %v2884_v8  ;;  %2202 = vmatmul.mubr.msk.bf16.vlgmr.msra.gmra.mrb[28].mxu1 %vm298_vm2, %v1231_v19 }
 0xa5b   :  { %2206 = vmatpush3.bf16.xpose.msra.mxu0 %v1289_v23  ;;  %2212 = vmatpush3.bf16.xpose.msra.mxu1 %v1340_v20 }
 0xa5c   :  { %2207 = vmatprep.mubr.msk.bf16.mxu0 %vm2547_vm0, %v2546_v0  ;;  %2213 = vmatprep.mubr.msk.bf16.mxu1 %vm2547_vm0, %v2546_v0 }
 0xa5d   :  { %2217 = vmatprep.subr.bf16.mxu0 %v2546_v0  ;;  %2223 = vmatprep.subr.bf16.mxu1 %v2546_v0  ;;  %v1282_v27 = vpop.permute.xlu1 %1281 }
 0xa62   :  { %2208 = vmatmul.mubr.msk.bf16.vlgmr.msra.gmra.mrb[28].mxu0 %vm298_vm2, %v1282_v27  ;;  %2214 = vmatmul.mubr.msk.bf16.vlgmr.msra.gmra.mrb[32].mxu1 %vm298_vm2, %v1333_v1 }
 0xa63   :  { %2219 = vmatprep.mubr.msk.bf16.mxu0 %vm2547_vm0, %v2546_v0  ;;  %2225 = vmatprep.mubr.msk.bf16.mxu1 %vm2547_vm0, %v2546_v0 }
 0xb2d   :  { %v1223_v28 = vpop.f32.mrb[24].mxu0  ;;  %v1274_v29 = vpop.f32.mrb[28].mxu1 }
 0xb2e   :  { %v1383_v30 = vadd.f32 %v1223_v28, %v2728_v45  ;;  %v2197_v32 = vpop.f32.mrb[25].mxu0  ;;  %v2203_v33 = vpop.f32.mrb[29].mxu1  ;;  %v1385_v21 = vadd.f32 %v1274_v29, %v2735_v55 }
 0xb2f   :  { %v1226_v34 = vpop.f32.mrb[26].mxu0  ;;  %v1277_v35 = vpop.f32.mrb[30].mxu1 }
 0xb30   :  { %v1384_v37 = vadd.f32 %v1226_v34, %v2731_v49  ;;  %v1386_v38 = vadd.f32 %v1277_v35, %v2739_v61  ;;  %v2198_v39 = vpop.f32.mrb[27].mxu0  ;;  %v2204_v40 = vpop.f32.mrb[31].mxu1  ;;  %v1391_v41 = vsel %vm507_vm6, %v1383_v30, -inf  ;;  %v1397_v61 = vsel %vm507_vm6, %v1385_v21, -inf }
 0xb31   :  { %1392 = vmax.xlane.f32.xlu1 %v1391_v41 }
 0xb32   :  { %v1394_v43 = vsel %vm507_vm6, %v1384_v37, -inf  ;;  %v1400_v45 = vsel %vm507_vm6, %v1386_v38, -inf }
 0xb33   :  { %1395 = vmax.xlane.f32.xlu0 %v1394_v43 }
 0xb35   :  { %v1325_v44 = vpop.f32.mrb[28].mxu0  ;;  %1401 = vmax.xlane.f32.xlu1 %v1400_v45  ;;  %v1376_v46 = vpop.f32.mrb[32].mxu1 }
 0xb36   :  { %v1387_v51 = vadd.f32 %v1325_v44, %v2743_v6  ;;  %v2209_v49 = vpop.f32.mrb[29].mxu0  ;;  %v2215_v52 = vpop.f32.mrb[33].mxu1  ;;  %v1389_v56 = vadd.f32 %v1376_v46, %v2751_v22 }
 0xb37   :  { %v1328_v53 = vpop.f32.mrb[30].mxu0  ;;  %1398 = vmax.xlane.f32.xlu0 %v1397_v61  ;;  %v1379_v54 = vpop.f32.mrb[34].mxu1 }
 0xb38   :  { %v1388_v57 = vadd.f32 %v1328_v53, %v2746_v15  ;;  %v2210_v55 = vpop.f32.mrb[31].mxu0  ;;  %v2216_v50 = vpop.f32.mrb[35].mxu1  ;;  %v1390_v3 = vadd.f32 %v1379_v54, %v2754_v26  ;;  %v1403_v13 = vsel %vm507_vm6, %v1387_v51, -inf  ;;  %v1409_v6 = vsel %vm507_vm6, %v1389_v56, -inf }
 0xb3a   :  { %v1406_v62 = vsel %vm507_vm6, %v1388_v57, -inf  ;;  %v1412_v4 = vsel %vm507_vm6, %v1390_v3, -inf }
 0xb3b   :  { %1404 = vmax.xlane.f32.xlu0 %v1403_v13  ;;  %1407 = vmax.xlane.f32.xlu1 %v1406_v62 }
 0xb3f   :  { %1410 = vmax.xlane.f32.xlu0 %v1409_v6  ;;  %1413 = vmax.xlane.f32.xlu1 %v1412_v4 }
 0xb50   :  { %1530 = vrot.lane.b32.xlu1 %v2884_v8, %s2556_s20 }
 0xb55   :  { %1483 = vrot.lane.b32.xlu0 %v2884_v8, %s2543_s0  ;;  %s2562_s0 = smov [#allocation10]  }
 0xb56   :  { %s1987_s25 = sshll.u32 %s2562_s0, 4  ;;  %s1988_s25 = int_to_ptr.vmem [resolvable:$true] %s1987_s25 }
 0xb57   :  { %s2508_s26 = scalar_lea.vmem %s1988_s25, 256  ;;  %p2513_p5 = scmp.lt.s32.totalorder %s1988_s25, %s1988_s25 }
 0xb58   :  { %p2509_p4 = scmp.ne.s32.totalorder %s1988_s25, %s2508_s26  ;;  %p2514_p6 = scmp.lt.s32.totalorder %s2508_s26, %s2508_s26 }
 0xb5a   :  { %p2515_p7 = por %p2514_p6, %p2513_p5 }
 0xb5c   :  { %p2516_p8 = pnand %p2515_p7, %p2509_p4 }
 0xbbe   :  { %v1393_v15 = vpop.xlane.xlu1 %1392 }
 0xbbf   :  { %v1415_v22 = vsub.f32 %v1383_v30, %v1393_v15 }
 0xbc0   :  { %v1396_v26 = vpop.xlane.xlu0 %1395 }
 0xbc1   :  { %v1423_v5 = vmul.f32 1.442695, %v1415_v22  ;;  %v1416_v9 = vsub.f32 %v1384_v37, %v1396_v26 }
 0xbc2   :  { %v1402_v7 = vpop.xlane.xlu1 %1401 }
 0xbc3   :  { %2380 = vpow2.f32 %v1423_v5  ;;  %v1425_v12 = vmul.f32 1.442695, %v1416_v9  ;;  %v1418_v10 = vsub.f32 %v1386_v38, %v1402_v7 }
 0xbc4   :  { %v1399_v14 = vpop.xlane.xlu0 %1398 }
 0xbc5   :  { %2382 = vpow2.f32 %v1425_v12  ;;  %v1429_v16 = vmul.f32 1.442695, %v1418_v10  ;;  %v1417_v17 = vsub.f32 %v1385_v21, %v1399_v14 }
 0xbc7   :  { %2384 = vpow2.f32 %v1429_v16  ;;  %v1427_v18 = vmul.f32 1.442695, %v1417_v17 }
 0xbc8   :  { %v1405_v19 = vpop.xlane.xlu0 %1404  ;;  %v1408_v20 = vpop.xlane.xlu1 %1407 }
 0xbc9   :  { %2386 = vpow2.f32 %v1427_v18  ;;  %v1419_v23 = vsub.f32 %v1387_v51, %v1405_v19  ;;  %v1420_v1 = vsub.f32 %v1388_v57, %v1408_v20 }
 0xbcb   :  { %v1431_v27 = vmul.f32 1.442695, %v1419_v23  ;;  %v1433_v28 = vmul.f32 1.442695, %v1420_v1 }
 0xbcc   :  { %v1411_v29 = vpop.xlane.xlu0 %1410  ;;  %v1414_v30 = vpop.xlane.xlu1 %1413 }
 0xbcd   :  { %v2381_v32 = vpop.eup %2380  ;;  %2388 = vpow2.f32 %v1431_v27  ;;  %v1421_v33 = vsub.f32 %v1389_v56, %v1411_v29  ;;  %v1422_v34 = vsub.f32 %v1390_v3, %v1414_v30 }
 0xbce   :  { %2390 = vpow2.f32 %v1433_v28  ;;  %v1439_v35 = vsel %vm507_vm6, %v2381_v32, 0.0 }
 0xbcf   :  { %v2383_v37 = vpop.eup %2382  ;;  %v1435_v38 = vmul.f32 1.442695, %v1421_v33  ;;  %v1437_v39 = vmul.f32 1.442695, %v1422_v34  ;;  %1440 = vadd.xlane.f32.xlu0 %v1439_v35 }
 0xbd0   :  { %v1484_v40 = vpop.permute.xlu0 %1483  ;;  %v1531_v41 = vpop.permute.xlu1 %1530  ;;  %v1442_v21 = vsel %vm507_vm6, %v2383_v37, 0.0 }
 0xbd1   :  { %v2385_v43 = vpop.eup %2384  ;;  %2392 = vpow2.f32 %v1435_v38  ;;  %2218 = vmatpush3.bf16.msra.mxu0 %v1484_v40  ;;  %1443 = vadd.xlane.f32.xlu1 %v1442_v21 }
 0xbd2   :  { %2394 = vpow2.f32 %v1437_v39  ;;  %2224 = vmatpush3.bf16.msra.mxu1 %v1531_v41  ;;  %2229 = vmatprep.subr.bf16.mxu0 %v2546_v0  ;;  %v1448_v46 = vsel %vm507_vm6, %v2385_v43, 0.0 }
 0xbd3   :  { %v2387_v45 = vpop.eup %2386  ;;  %2235 = vmatprep.subr.bf16.mxu1 %v2546_v0 }
 0xbd4   :  { %v1445_v44 = vsel %vm507_vm6, %v2387_v45, 0.0 }
 0xbd5   :  { %1446 = vadd.xlane.f32.xlu0 %v1445_v44  ;;  %1449 = vadd.xlane.f32.xlu1 %v1448_v46 }
 0xbd7   :  { %v2389_v51 = vpop.eup %2388 }
 0xbd8   :  { %v2391_v49 = vpop.eup %2390  ;;  %v1451_v52 = vsel %vm507_vm6, %v2389_v51, 0.0 }
 0xbd9   :  { %1452 = vadd.xlane.f32.xlu0 %v1451_v52  ;;  %v1454_v61 = vsel %vm507_vm6, %v2391_v49, 0.0 }
 0xbda   :  { %1455 = vadd.xlane.f32.xlu1 %v1454_v61 }
 0xbdb   :  { %v2393_v53 = vpop.eup %2392 }
 0xbdc   :  { %v2395_v54 = vpop.eup %2394  ;;  %v1457_v57 = vsel %vm507_vm6, %v2393_v53, 0.0 }
 0xbdd   :  { %1458 = vadd.xlane.f32.xlu0 %v1457_v57  ;;  %v1460_v55 = vsel %vm507_vm6, %v2395_v54, 0.0 }
 0xbde   :  { %1461 = vadd.xlane.f32.xlu1 %v1460_v55 }
 0xbef   :  { %1577 = vrot.lane.b32.xlu1 %v2884_v8, %s2557_s21 }
 0xbf3   :  { %1624 = vrot.lane.b32.xlu0 %v2884_v8, %s2558_s22  ;;  %1706 = vrot.lane.b32.xlu1 %v2854_v24, %s2559_s23 }
 0xc5c   :  { %v1441_v50 = vpop.xlane.xlu0 %1440 }
 0xc5d   :  { %2396 = vrcp.f32 %v1441_v50 }
 0xc5e   :  { %v1444_v56 = vpop.xlane.xlu1 %1443 }
 0xc5f   :  { %2398 = vrcp.f32 %v1444_v56 }
 0xc62   :  { %v1447_v3 = vpop.xlane.xlu0 %1446  ;;  %v1450_v13 = vpop.xlane.xlu1 %1449 }
 0xc63   :  { %2400 = vrcp.f32 %v1447_v3 }
 0xc64   :  { %2402 = vrcp.f32 %v1450_v13 }
 0xc66   :  { %v1453_v62 = vpop.xlane.xlu0 %1452 }
 0xc67   :  { %v2397_v6 = vpop.eup %2396  ;;  %2404 = vrcp.f32 %v1453_v62  ;;  %v1456_v4 = vpop.xlane.xlu1 %1455 }
 0xc68   :  { %2406 = vrcp.f32 %v1456_v4  ;;  %v1471_v22 = vmul.f32 %v2397_v6, %v2381_v32 }
 0xc69   :  { %v2399_v15 = vpop.eup %2398 }
 0xc6a   :  { %v1472_v26 = vmul.f32 %v2399_v15, %v2383_v37  ;;  %v1459_v8 = vpop.xlane.xlu0 %1458 }
 0xc6b   :  { %2408 = vrcp.f32 %v1459_v8  ;;  %v1462_v5 = vpop.xlane.xlu1 %1461 }
 0xc6c   :  { %2410 = vrcp.f32 %v1462_v5  ;;  %v1479_v24 = vpack.c.bf16 %v1472_v26, %v1471_v22 }
 0xc6d   :  { %v2401_v9 = vpop.eup %2400 }
 0xc6e   :  { %v2403_v7 = vpop.eup %2402  ;;  %v1473_v12 = vmul.f32 %v2401_v9, %v2387_v45  ;;  %2220 = vmatmul.mubr.msk.bf16.vlgmr.msra.gmra.mrb[32].mxu0 %vm507_vm6, %v1479_v24  ;;  %v1625_v23 = vpop.permute.xlu0 %1624 }
 0xc6f   :  { %v1474_v10 = vmul.f32 %v2403_v7, %v2385_v43  ;;  %v1578_v14 = vpop.permute.xlu1 %1577  ;;  %2231 = vmatprep.mubr.msk.bf16.mxu0 %vm2547_vm0, %v2546_v0 }
 0xc70   :  { %2230 = vmatpush3.bf16.msra.mxu0 %v1578_v14 }
 0xc71   :  { %v2405_v16 = vpop.eup %2404  ;;  %v1480_v17 = vpack.c.bf16 %v1474_v10, %v1473_v12  ;;  %2241 = vmatprep.subr.bf16.mxu0 %v2546_v0  ;;  %v1705_v12 = vrot.slane %v2879_v60, %v822_v48 }
 0xc72   :  { %v2407_v18 = vpop.eup %2406  ;;  %v1475_v19 = vmul.f32 %v2405_v16, %v2389_v51 }
 0xc73   :  { %v1476_v20 = vmul.f32 %v2407_v18, %v2391_v49  ;;  %2226 = vmatmul.mubr.msk.bf16.vlgmr.msra.gmra.mrb[36].mxu1 %vm507_vm6, %v1480_v17  ;;  %v1707_v33 = vpop.permute.xlu1 %1706 }
 0xc74   :  { %2236 = vmatpush3.bf16.msra.mxu1 %v1625_v23  ;;  %2237 = vmatprep.mubr.msk.bf16.mxu1 %vm2547_vm0, %v2546_v0 }
 0xc75   :  { %v2409_v1 = vpop.eup %2408  ;;  %v1481_v27 = vpack.c.bf16 %v1476_v20, %v1475_v19  ;;  %2249 = vmatprep.subr.bf16.mxu1 %v2546_v0 }
 0xc76   :  { %v2411_v28 = vpop.eup %2410  ;;  %v1477_v29 = vmul.f32 %v2409_v1, %v2393_v53 }
 0xc77   :  { %v1478_v30 = vmul.f32 %v2411_v28, %v2395_v54  ;;  %2232 = vmatmul.mubr.msk.bf16.vlgmr.msra.gmra.mrb[36].mxu0 %vm507_vm6, %v1481_v27 }
 0xc78   :  { %2245 = vmatprep.mubr.msk.bf16.mxu0 %vm2547_vm0, %v2546_v0  ;;  %2242 = vmatpush3.bf16.msra.mxu0 %v1707_v33  ;;  %v2337_v33 = vld [vmem:[#allocation7 + $0x68] sm:$0xff]  }
 0xc79   :  { %v1482_v32 = vpack.c.bf16 %v1478_v30, %v1477_v29  ;;  %2243 = vmatprep.subr.bf16.mxu0 %v2546_v0 }
 0xc7b   :  { %2238 = vmatmul.mubr.msk.bf16.vlgmr.msra.gmra.mrb[40].mxu1 %vm507_vm6, %v1482_v32  ;;  %v2334_v32 = vld [vmem:[#allocation7 + $0x50] sm:$0xff]  }
 0xc7c   :  { %2253 = vmatprep.mubr.msk.bf16.mxu1 %vm2547_vm0, %v2546_v0  ;;  %2250 = vmatpush3.bf16.msra.mxu1 %v2334_v32 }
 0xc7d   :  { %2251 = vmatprep.subr.bf16.mxu1 %v2546_v0 }
 0xd41   :  { %v1523_v34 = vpop.f32.mrb[32].mxu0 }
 0xd42   :  { %v2221_v35 = vpop.f32.mrb[33].mxu0 }
 0xd43   :  { %v1526_v37 = vpop.f32.mrb[34].mxu0 }
 0xd44   :  { %v2222_v38 = vpop.f32.mrb[35].mxu0 }
 0xd46   :  { %v1570_v39 = vpop.f32.mrb[36].mxu1 }
 0xd47   :  { %v2227_v40 = vpop.f32.mrb[37].mxu1 }
 0xd48   :  { %v1573_v41 = vpop.f32.mrb[38].mxu1 }
 0xd49   :  { %v2309_v21 = vpack.i.bf16 %v1573_v41, %v1570_v39  ;;  %v2228_v43 = vpop.f32.mrb[39].mxu1 }
 0xd4a   :  { %v1617_v45 = vpop.f32.mrb[36].mxu0 }
 0xd4b   :  { %v2233_v44 = vpop.f32.mrb[37].mxu0  ;;  %2310 = vrot.lane.b32.xlu0 %v2309_v21, %s2541_s28 }
 0xd4c   :  { %v1620_v46 = vpop.f32.mrb[38].mxu0 }
 0xd4d   :  { %v2314_v51 = vpack.i.bf16 %v1620_v46, %v1617_v45  ;;  %v2234_v49 = vpop.f32.mrb[39].mxu0 }
 0xd4e   :  { %v1664_v52 = vpop.f32.mrb[40].mxu1 }
 0xd4f   :  { %2315 = vrot.lane.b32.xlu1 %v2314_v51, %s2560_s24  ;;  %v2239_v61 = vpop.f32.mrb[41].mxu1 }
 0xd50   :  { %v1667_v53 = vpop.f32.mrb[42].mxu1 }
 0xd51   :  { %v2319_v54 = vpack.i.bf16 %v1667_v53, %v1664_v52  ;;  %v2240_v57 = vpop.f32.mrb[43].mxu1 }
 0xd53   :  { %2320 = vrot.lane.b32.xlu0 %v2319_v54, %s2561_s18  ;;  %1708 = vrot.lane.b32.xlu1 %v2857_v25, %s2559_s23  ;;  %v1791_v54 = vrot.slane %v2879_v60, %v908_v31  ;;  %v1804_v31 = vrot.slane %v2879_v60, %v921_v47 }
 0xdbd   :  { %v2311_v55 = vpop.permute.xlu0 %2310 }
 0xdbe   :  { %v2313_v56 = vunpack.i.h.bf16 %v2311_v55  ;;  %v2312_v3 = vunpack.i.l.bf16 %v2311_v55 }
 0xdc0   :  { %v1696_v15 = vsel %vm298_vm2, %v1526_v37, %v2313_v56  ;;  %v1695_v22 = vsel %vm298_vm2, %v1523_v34, %v2312_v3  ;;  %v1797_v3 = vrot.slane %v2879_v60, %v914_v36 }
 0xdc1   :  { %v2316_v50 = vpop.permute.xlu1 %2315 }
 0xdc2   :  { %v2318_v13 = vunpack.i.h.bf16 %v2316_v50  ;;  %v2317_v62 = vunpack.i.l.bf16 %v2316_v50 }
 0xdc4   :  { %v1697_v5 = vsel %vm507_vm6, %v1695_v22, %v2317_v62  ;;  %v1698_v24 = vsel %vm507_vm6, %v1696_v15, %v2318_v13  ;;  %v2338_v15 = vld [vmem:[#allocation7 + $0x70] sm:$0xff]   ;;  %v2339_v22 = vld [vmem:[#allocation7 + $0x78] sm:$0xff]  }
 0xdc5   :  { %v2321_v6 = vpop.permute.xlu0 %2320  ;;  %v1709_v4 = vpop.permute.xlu1 %1708 }
 0xdc6   :  { %v2323_v26 = vunpack.i.h.bf16 %v2321_v6  ;;  %v2322_v8 = vunpack.i.l.bf16 %v2321_v6  ;;  %2244 = vmatpush3.bf16.msra.mxu0 %v1709_v4 }
 0xdc7   :  { %2257 = vmatprep.subr.bf16.mxu0 %v2546_v0 }
 0xdc8   :  { %v1700_v25 = vsel %vm816_vm12, %v1698_v24, %v2323_v26  ;;  %v1699_v9 = vsel %vm816_vm12, %v1697_v5, %v2322_v8 }
 0xdc9   :  { %v1701_v7 = vpack.c.bf16 %v1700_v25, %v1699_v9 }
 0xdcb   :  { %2246 = vmatmul.mubr.msk.bf16.vlgmr.msra.gmra.mrb[40].mxu0 %vm249_vm1, %v1701_v7 }
 0xdcc   :  { %2265 = vmatprep.mubr.msk.bf16.mxu0 %vm2547_vm0, %v2546_v0 }
 0xe9e   :  { %v1749_v10 = vpop.f32.mrb[40].mxu0 }
 0xe9f   :  { %v1750_v14 = vadd.f32 %v1749_v10, %v1705_v12  ;;  %v2247_v16 = vpop.f32.mrb[41].mxu0 }
 0xea0   :  { %v1752_v17 = vpop.f32.mrb[42].mxu0 }
 0xea1   :  { %v1756_v18 = vadd.f32 %v1750_v14, %v2870_v58  ;;  %v1753_v19 = vadd.f32 %v1752_v17, %v1705_v12  ;;  %v2248_v20 = vpop.f32.mrb[43].mxu0  ;;  %v2335_v58 = vld [vmem:[#allocation7 + $0x58] sm:$0xff]  }
 0xea2   :  { %2252 = vmatpush3.bf16.msra.mxu1 %v2335_v58 }
 0xea3   :  { %v1757_v23 = vadd.f32 %v1753_v19, %v2872_v59  ;;  %v1758_v1 = vsel %vm249_vm1, %v1756_v18, 0.0  ;;  %v1764_v27 = vmul.f32 %v1756_v18, %v1756_v18  ;;  %v2336_v59 = vld [vmem:[#allocation7 + $0x60] sm:$0xff]  }
 0xea4   :  { %1759 = vadd.xlane.f32.xlu0 %v1758_v1  ;;  %2258 = vmatpush3.bf16.msra.mxu0 %v2336_v59 }
 0xea5   :  { %v1761_v28 = vsel %vm249_vm1, %v1757_v23, 0.0  ;;  %v1766_v29 = vsel %vm249_vm1, %v1764_v27, 0.0  ;;  %v1765_v48 = vmul.f32 %v1757_v23, %v1757_v23  ;;  %2259 = vmatprep.subr.bf16.mxu0 %v2546_v0 }
 0xea6   :  { %1762 = vadd.xlane.f32.xlu1 %v1761_v28 }
 0xea7   :  { %v1769_v30 = vsel %vm249_vm1, %v1765_v48, 0.0 }
 0xea8   :  { %1767 = vadd.xlane.f32.xlu0 %v1766_v29  ;;  %2260 = vmatpush3.bf16.msra.mxu0 %v2337_v33 }
 0xea9   :  { %2261 = vmatprep.subr.bf16.mxu0 %v2546_v0 }
 0xeac   :  { %1770 = vadd.xlane.f32.xlu0 %v1769_v30  ;;  %2262 = vmatpush3.bf16.msra.mxu0 %v2338_v15 }
 0xead   :  { %2263 = vmatprep.subr.bf16.mxu0 %v2546_v0  ;;  %v1867_v0 = vrot.slane %v2879_v60, %v984_v63 }
 0xeb0   :  { %2264 = vmatpush3.bf16.msra.mxu0 %v2339_v22 }
 0xf31   :  { %v1760_v34 = vpop.xlane.xlu0 %1759 }
 0xf32   :  { %v1772_v35 = vmul.f32 0.03125, %v1760_v34 }
 0xf33   :  { %v1763_v37 = vpop.xlane.xlu1 %1762 }
 0xf34   :  { %v1776_v39 = vmul.f32 %v1772_v35, %v1772_v35  ;;  %v1773_v40 = vmul.f32 0.03125, %v1763_v37  ;;  %v1780_v52 = vsub.f32 %v1756_v18, %v1772_v35 }
 0xf35   :  { %v1768_v38 = vpop.xlane.xlu0 %1767 }
 0xf36   :  { %v1774_v41 = vmul.f32 0.03125, %v1768_v38  ;;  %v1777_v45 = vmul.f32 %v1773_v40, %v1773_v40  ;;  %v1781_v57 = vsub.f32 %v1757_v23, %v1773_v40 }
 0xf38   :  { %v1778_v21 = vsub.f32 %v1774_v41, %v1776_v39 }
 0xf39   :  { %v1771_v43 = vpop.xlane.xlu0 %1770 }
 0xf3a   :  { %v1782_v44 = vadd.f32 1e-05, %v1778_v21  ;;  %v1775_v46 = vmul.f32 0.03125, %v1771_v43 }
 0xf3c   :  { %2412 = vrsqrt.f32 %v1782_v44  ;;  %v1779_v51 = vsub.f32 %v1775_v46, %v1777_v45  ;;  %v1971_v45 = vrot.slane %v2879_v60, %v1089_v42 }
 0xf3e   :  { %v1783_v49 = vadd.f32 1e-05, %v1779_v51 }
 0xf40   :  { %2414 = vrsqrt.f32 %v1783_v49  ;;  %v1977_v49 = vrot.slane %v2879_v60, %v1095_v2 }
 0xf46   :  { %v2413_v61 = vpop.eup %2412 }
 0xf47   :  { %v1786_v53 = vmul.f32 %v2413_v61, %v1780_v52 }
 0xf49   :  { %v1792_v56 = vmul.f32 %v1791_v54, %v1786_v53 }
 0xf4a   :  { %v2415_v55 = vpop.eup %2414 }
 0xf4b   :  { %v1787_v50 = vmul.f32 %v2415_v55, %v1781_v57  ;;  %v1798_v62 = vadd.f32 %v1797_v3, %v1792_v56 }
 0xf4d   :  { %v1793_v13 = vmul.f32 %v1791_v54, %v1787_v50 }
 0xf4f   :  { %v1799_v6 = vadd.f32 %v1797_v3, %v1793_v13 }
 0xf51   :  { %v1800_v4 = vpack.c.bf16 %v1799_v6, %v1798_v62 }
 0xf53   :  { %2254 = vmatmul.mubr.msk.bf16.vlgmr.msra.gmra.mrb[44].mxu1 %vm249_vm1, %v1800_v4 }
0x1026   :  { %v1854_v26 = vpop.f32.mrb[44].mxu1 }
0x1027   :  { %v1855_v8 = vadd.f32 %v1854_v26, %v1804_v31  ;;  %v2255_v5 = vpop.f32.mrb[45].mxu1 }
0x1028   :  { %v1857_v36 = vpop.f32.mrb[46].mxu1 }
0x1029   :  { %v1858_v24 = vadd.f32 %v1857_v36, %v1804_v31  ;;  %v2256_v25 = vpop.f32.mrb[47].mxu1  ;;  %v1861_v9 = vmax.f32 %v1855_v8, 0.0 }
0x102b   :  { %v1862_v7 = vmax.f32 %v1858_v24, 0.0 }
0x102d   :  { %v1863_v12 = vpack.c.bf16 %v1862_v7, %v1861_v9 }
0x102f   :  { %2266 = vmatmul.mubr.msk.bf16.vlgmr.msra.gmra.mrb[44].mxu0 %vm1010_vm13, %v1863_v12 }
0x1102   :  { %v1929_v10 = vpop.f32.mrb[44].mxu0 }
0x1103   :  { %v1930_v14 = vadd.f32 %v1929_v10, %v1867_v0  ;;  %v2267_v16 = vpop.f32.mrb[45].mxu0 }
0x1104   :  { %v1932_v17 = vpop.f32.mrb[46].mxu0 }
0x1105   :  { %v1936_v47 = vadd.f32 %v1930_v14, %v1798_v62  ;;  %v1933_v18 = vadd.f32 %v1932_v17, %v1867_v0  ;;  %v2268_v19 = vpop.f32.mrb[47].mxu0 }
0x1107   :  { %v1937_v20 = vadd.f32 %v1933_v18, %v1799_v6  ;;  %v1938_v23 = vsel %vm249_vm1, %v1936_v47, 0.0  ;;  %v1944_v1 = vmul.f32 %v1936_v47, %v1936_v47 }
0x1108   :  { %1939 = vadd.xlane.f32.xlu1 %v1938_v23 }
0x1109   :  { %v1941_v27 = vsel %vm249_vm1, %v1937_v20, 0.0  ;;  %v1945_v28 = vmul.f32 %v1937_v20, %v1937_v20  ;;  %v1946_v29 = vsel %vm249_vm1, %v1944_v1, 0.0 }
0x110a   :  { %1942 = vadd.xlane.f32.xlu0 %v1941_v27 }
0x110b   :  { %v1949_v63 = vsel %vm249_vm1, %v1945_v28, 0.0 }
0x110c   :  { %1947 = vadd.xlane.f32.xlu1 %v1946_v29 }
0x110e   :  { %1950 = vadd.xlane.f32.xlu0 %v1949_v63 }
0x1195   :  { %v1940_v48 = vpop.xlane.xlu1 %1939 }
0x1196   :  { %v1952_v30 = vmul.f32 0.03125, %v1940_v48 }
0x1197   :  { %v1943_v32 = vpop.xlane.xlu0 %1942 }
0x1198   :  { %v1953_v58 = vmul.f32 0.03125, %v1943_v32  ;;  %v1956_v33 = vmul.f32 %v1952_v30, %v1952_v30  ;;  %v1960_v43 = vsub.f32 %v1936_v47, %v1952_v30 }
0x1199   :  { %v1948_v59 = vpop.xlane.xlu1 %1947 }
0x119a   :  { %v1954_v34 = vmul.f32 0.03125, %v1948_v59  ;;  %v1957_v37 = vmul.f32 %v1953_v58, %v1953_v58  ;;  %v1961_v46 = vsub.f32 %v1937_v20, %v1953_v58 }
0x119b   :  { %v1951_v35 = vpop.xlane.xlu0 %1950 }
0x119c   :  { %v1958_v38 = vsub.f32 %v1954_v34, %v1956_v33  ;;  %v1955_v39 = vmul.f32 0.03125, %v1951_v35 }
0x119e   :  { %v1962_v40 = vadd.f32 1e-05, %v1958_v38  ;;  %v1959_v41 = vsub.f32 %v1955_v39, %v1957_v37 }
0x11a0   :  { %2416 = vrsqrt.f32 %v1962_v40  ;;  %v1963_v21 = vadd.f32 1e-05, %v1959_v41 }
0x11a2   :  { %2418 = vrsqrt.f32 %v1963_v21 }
0x11aa   :  { %v2417_v44 = vpop.eup %2416 }
0x11ab   :  { %v1966_v51 = vmul.f32 %v2417_v44, %v1960_v43 }
0x11ac   :  { %v2419_v52 = vpop.eup %2418 }
0x11ad   :  { %v1967_v61 = vmul.f32 %v2419_v52, %v1961_v46  ;;  %v1972_v53 = vmul.f32 %v1971_v45, %v1966_v51 }
0x11af   :  { %v1973_v54 = vmul.f32 %v1971_v45, %v1967_v61  ;;  %v1978_v57 = vadd.f32 %v1977_v49, %v1972_v53 }
0x11b1   :  { %v1979_v55 = vadd.f32 %v1977_v49, %v1973_v54  ;;  %1980 = vst.msk [vmem:[#allocation10] sm:$0xff] %vm249_vm1, %v1978_v57 }
0x11b3   :  { %1981 = vst.msk [vmem:[#allocation10 + $0x8] sm:$0xff] %vm249_vm1, %v1979_v55 }
0x11b4   :  { %2519 = shalt.err (!%p2516_p8)
}
0x11b5   :  { %s2520_s5 = scalar_lea.hbm %s3045_s4, 256 }
0x11b6   :  { %p2521_p9 = scmp.ne.s32.totalorder %s3045_s4, %s2520_s5  ;;  %p2524_p10 = scmp.lt.u32.totalorder %s2520_s5, %s3045_s4 }
0x11b8   :  { %p2526_p11 = pnand %p2524_p10, %p2521_p9 }
0x11ba   :  { %2529 = shalt.err (!%p2526_p11)
}
0x11bb   :  { %1993 = dma.vmem_to_hbm [thread:$0]  %s1988_s25, 256, %s3045_s4, [#allocation4], %s2540_s27, %s2540_s27, %s2541_s28  }
0x11bc   :  { %2536 = dma.done.wait [#allocation4], 256  }
0x11bd   :  { %2537 = vsyncadd [#allocation4], 4294967040 }
0x11be   :  { %1997 = vsyncpa [#allocation3], 1 }
0x11bf   :  { %1998 = vsyncpa [#allocation6], 1 }
0x11c0   :  { %1999 = vsyncpa [#allocation9], 1 }
0x11c1   :  { %2000 = vsyncpa [#allocation4], 1 }

</bundles_post_ra>
